<compile_context>
chip_gen: v6e
topology: v6e:2x2x1
jax: 0.10.0
libtpu: 0.0.40
codegen_flags: <defaults>
</compile_context>

<pallas_src>
import jax
import jax.numpy as jnp
from jax.experimental import pallas as pl
from jax.experimental.pallas import tpu as pltpu

# ---- model hyper-parameters (small, consistent with the module) -------------
N_NODES = 8                     # input_shape[0]  (nodes per graph)
C_IN = 8                        # input_shape[1]  == NNConv in_channels
C_OUT = 128                     # NNConv out_channels (fixed by the module)
BATCH = 2
NUM_ACTIONS = (6, 6)            # self.num_actions
N_HEADS = len(NUM_ACTIONS)
A_SUM = sum(NUM_ACTIONS)
PER = A_SUM // N_HEADS
HIDDEN = 64
NTOT = BATCH * N_NODES          # flattened batch: one big graph (x.view(B*N, C))
FEAT = N_NODES * C_OUT          # self.feature_size()
HEAD_OUT = HIDDEN + A_SUM       # fused val1 (lanes 0..63) + adv (lanes 64..75)


# ---------------------------------------------------------------------------
# Fused kernel: edge MLP -> messages -> scatter-add -> root + bias -> ReLU,
# followed by the dueling heads, all in one grid-less pallas_call.
# ---------------------------------------------------------------------------
def bhs_nn_kernel(ea_ref, w1e_ref, b1e_ref, w2e_ref, b2e_ref,
                  src_ref, dst_ref, x_ref, wroot_ref, bconv_ref,
                  hw_ref, hb_ref, wv2_ref, bv2_ref, wv3_ref, bv3_ref,
                  out_ref, h_scr):
    f32 = jnp.float32
    n_edges = ea_ref.shape[0]

    # -- NNConv edge network, layer 1: Linear(1,64) is a rank-1 outer product
    #    -> pure VPU broadcast FMA, no K=1 MXU pass.
    h2 = jnp.maximum(ea_ref[...] * w1e_ref[...] + b1e_ref[...], 0.0)        # (E, 64)

    # -- in-kernel gather of source features: x_src = onehot(src) @ x --------
    lane_node = jax.lax.broadcasted_iota(jnp.int32, (n_edges, NTOT), 1)
    gath = (lane_node == src_ref[...]).astype(f32)                          # (E, NTOT)
    x_src = jnp.dot(gath, x_ref[...], preferred_element_type=f32)           # (E, C_IN)

    # -- edge-net layer 2 chunked over 128 output lanes, fused with the
    #    per-input-channel message multiply (caps live vregs, MXU/VPU overlap)
    msg = jnp.zeros((n_edges, C_OUT), f32)
    for c in range(C_IN):
        lo = c * C_OUT
        w_chunk = jnp.dot(h2, w2e_ref[:, lo:lo + C_OUT],
                          preferred_element_type=f32) + b2e_ref[:, lo:lo + C_OUT]
        msg = msg + x_src[:, c:c + 1] * w_chunk                             # (E, C_OUT)

    # -- scatter-add at destinations (one-hot f32 matmul, exact) + root + bias
    row_node = jax.lax.broadcasted_iota(jnp.int32, (NTOT, n_edges), 0)
    scat = (row_node == dst_ref[...]).astype(f32)                           # (NTOT, E)
    agg = jnp.dot(scat, msg, preferred_element_type=f32)                    # (NTOT, C_OUT)
    root = jnp.dot(x_ref[...], wroot_ref[...], preferred_element_type=f32)  # (NTOT, C_OUT)
    h_scr[...] = jnp.maximum(agg + root + bconv_ref[...], 0.0)              # (NTOT, C_OUT)

    # -- fused val1/adv projection accumulated per node: no (B, N*128) flatten.
    #    Rows of node n across the batch are a strided sublane slice
    #    (stride = N_NODES); head_w row blocks are 128-aligned.
    hz = jnp.zeros((BATCH, HEAD_OUT), f32)
    for n in range(N_NODES):
        h_n = h_scr[pl.ds(n, BATCH, stride=N_NODES), :]                     # (B, C_OUT)
        hz = hz + jnp.dot(h_n, hw_ref[n * C_OUT:(n + 1) * C_OUT, :],
                          preferred_element_type=f32)
    hz = hz + hb_ref[...]                                                   # (B, HEAD_OUT)

    v = jnp.maximum(hz[:, 0:HIDDEN], 0.0)                                   # (B, 64), lane 0 aligned
    adv = jnp.maximum(hz[:, HIDDEN:HIDDEN + A_SUM], 0.0)                    # (B, A_SUM)

    v = jnp.maximum(jnp.dot(v, wv2_ref[...], preferred_element_type=f32)
                    + bv2_ref[...], 0.0)                                    # (B, 64)

    # -- val3 as VPU multiply + lane reduce (no 1-wide MXU output) -----------
    val = jnp.sum(v * wv3_ref[...], axis=-1, keepdims=True) + bv3_ref[...]  # (B, 1)

    # -- dueling combine; single full store of the (B, A_SUM) result ---------
    parts = []
    for hh in range(N_HEADS):
        a_h = adv[:, hh * PER:(hh + 1) * PER]
        m_h = jnp.mean(a_h, axis=-1, keepdims=True)
        parts.append(jnp.broadcast_to(m_h, (BATCH, PER)))
    mean_b = jnp.concatenate(parts, axis=-1)                                # (B, A_SUM)
    out_ref[...] = val + adv - mean_b


# ---------------------------------------------------------------------------
# One-time weight prep (kept out of the per-call jitted path): fuse the
# val1/adv projections, val1 first so the 64-wide slice is lane-0 aligned.
# ---------------------------------------------------------------------------
def prepare_params(p):
    q = dict(p)
    q["head_w"] = jnp.concatenate([p["wv1"], p["wa"]], axis=1)   # (FEAT, HEAD_OUT)
    q["head_b"] = jnp.concatenate([p["bv1"], p["ba"]], axis=1)   # (1, HEAD_OUT)
    return q


# ---------------------------------------------------------------------------
# Wrapper: minimal glue (reshape x, split/reshape edge indices) + one
# grid-less pallas_call with full-array VMEM blocks.
# ---------------------------------------------------------------------------
@jax.jit
def bhs_nn_forward(x, edge_index, edge_attr, p):
    xn = x.reshape(NTOT, C_IN).astype(jnp.float32)            # x.view(B*N, C)
    n_edges = edge_attr.shape[0]
    src = edge_index[0].reshape(n_edges, 1).astype(jnp.int32)  # (E, 1) sublane vector
    dst = edge_index[1].reshape(1, n_edges).astype(jnp.int32)  # (1, E) lane vector

    args = (edge_attr.astype(jnp.float32), p["w1e"], p["b1e"], p["w2e"], p["b2e"],
            src, dst, xn, p["wroot"], p["bconv"],
            p["head_w"], p["head_b"], p["wv2"], p["bv2"], p["wv3row"], p["bv3"])

    vmem = pl.BlockSpec(memory_space=pltpu.MemorySpace.VMEM)
    flat = pl.pallas_call(
        bhs_nn_kernel,
        out_shape=jax.ShapeDtypeStruct((BATCH, A_SUM), jnp.float32),
        in_specs=[vmem] * len(args),
        out_specs=vmem,
        scratch_shapes=[pltpu.VMEM((NTOT, C_OUT), jnp.float32)],
    )(*args)
    return flat.reshape(BATCH, N_HEADS, PER)                   # adv.view(B, len(num_actions), -1)


# ---------------------------------------------------------------------------
# Pure-JAX f32 reference of the module's forward, for correctness check.
# ---------------------------------------------------------------------------
def reference_forward(x, edge_index, edge_attr, p):
    xn = x.reshape(NTOT, C_IN)
    h2 = jnp.maximum(edge_attr @ p["w1e"] + p["b1e"], 0.0)                  # (E, 64)
    w_edges = (h2 @ p["w2e"] + p["b2e"]).reshape(-1, C_IN, C_OUT)           # (E, C_IN, C_OUT)
    x_src = xn[edge_index[0]]                                               # (E, C_IN)
    msg = jnp.einsum("ec,eco->eo", x_src, w_edges)                          # (E, C_OUT)
    agg = jnp.zeros((NTOT, C_OUT), jnp.float32).at[edge_index[1]].add(msg)
    h = jnp.maximum(agg + xn @ p["wroot"] + p["bconv"], 0.0)                # (NTOT, C_OUT)
    xf = h.reshape(BATCH, FEAT)
    adv = jnp.maximum(xf @ p["wa"] + p["ba"], 0.0)
    v = jnp.maximum(xf @ p["wv1"] + p["bv1"], 0.0)
    v = jnp.maximum(v @ p["wv2"] + p["bv2"], 0.0)
    val = v @ p["wv3row"].T + p["bv3"]                                      # (B, 1)
    adv3 = adv.reshape(BATCH, N_HEADS, PER)
    return val[:, :, None] + adv3 - adv3.mean(-1, keepdims=True)


if __name__ == "__main__":
    key = jax.random.PRNGKey(0)
    ks = jax.random.split(key, 20)

    # synthetic parameters (torch Linear weights stored pre-transposed)
    params = {
        "w1e":    0.1 * jax.random.normal(ks[0], (1, 64), jnp.float32),
        "b1e":    0.1 * jax.random.normal(ks[1], (1, 64), jnp.float32),
        "w2e":    0.1 * jax.random.normal(ks[2], (64, C_IN * C_OUT), jnp.float32),
        "b2e":    0.1 * jax.random.normal(ks[3], (1, C_IN * C_OUT), jnp.float32),
        "wroot":  0.1 * jax.random.normal(ks[4], (C_IN, C_OUT), jnp.float32),
        "bconv":  0.1 * jax.random.normal(ks[5], (1, C_OUT), jnp.float32),
        "wa":     0.1 * jax.random.normal(ks[6], (FEAT, A_SUM), jnp.float32),
        "ba":     0.1 * jax.random.normal(ks[7], (1, A_SUM), jnp.float32),
        "wv1":    0.1 * jax.random.normal(ks[8], (FEAT, HIDDEN), jnp.float32),
        "bv1":    0.1 * jax.random.normal(ks[9], (1, HIDDEN), jnp.float32),
        "wv2":    0.1 * jax.random.normal(ks[10], (HIDDEN, HIDDEN), jnp.float32),
        "bv2":    0.1 * jax.random.normal(ks[11], (1, HIDDEN), jnp.float32),
        "wv3row": 0.1 * jax.random.normal(ks[12], (1, HIDDEN), jnp.float32),
        "bv3":    0.1 * jax.random.normal(ks[13], (1, 1), jnp.float32),
    }
    prepped = prepare_params(params)   # one-time weight prep, outside the jitted path

    # input x: (batch, nodes_per_graph, in_channels)
    x = jax.random.normal(ks[14], (BATCH, N_NODES, C_IN), jnp.float32)

    # deterministic edge list: bidirectional ring inside each graph of the batch
    src_l, dst_l = [], []
    for b in range(BATCH):
        base = b * N_NODES
        for k in range(N_NODES):
            nxt = base + (k + 1) % N_NODES
            src_l += [base + k, nxt]
            dst_l += [nxt, base + k]
    edge_index = jnp.array([src_l, dst_l], dtype=jnp.int32)        # (2, E), E = 32
    edge_attr = jax.random.uniform(ks[15], (edge_index.shape[1], 1), jnp.float32)

    out = bhs_nn_forward(x, edge_index, edge_attr, prepped)
    out = jax.block_until_ready(out)
    assert out.shape == (BATCH, N_HEADS, PER), out.shape

    ref = reference_forward(x, edge_index, edge_attr, params)
    # kernel is all-f32; tolerance only covers matmul pass-precision differences
    assert jnp.allclose(out, ref, rtol=1e-2, atol=1e-2), float(jnp.max(jnp.abs(out - ref)))

    print("KERNEL_OK")
</pallas_src>

<mosaic_0001>
module attributes {stable_mosaic.version = 11 : i64} {
  func.func @bhs_nn_kernel(%arg0: memref<32x1xf32, #tpu.memory_space<vmem>>, %arg1: memref<1x64xf32, #tpu.memory_space<vmem>>, %arg2: memref<1x64xf32, #tpu.memory_space<vmem>>, %arg3: memref<64x1024xf32, #tpu.memory_space<vmem>>, %arg4: memref<1x1024xf32, #tpu.memory_space<vmem>>, %arg5: memref<32x1xi32, #tpu.memory_space<vmem>>, %arg6: memref<1x32xi32, #tpu.memory_space<vmem>>, %arg7: memref<16x8xf32, #tpu.memory_space<vmem>>, %arg8: memref<8x128xf32, #tpu.memory_space<vmem>>, %arg9: memref<1x128xf32, #tpu.memory_space<vmem>>, %arg10: memref<1024x76xf32, #tpu.memory_space<vmem>>, %arg11: memref<1x76xf32, #tpu.memory_space<vmem>>, %arg12: memref<64x64xf32, #tpu.memory_space<vmem>>, %arg13: memref<1x64xf32, #tpu.memory_space<vmem>>, %arg14: memref<1x64xf32, #tpu.memory_space<vmem>>, %arg15: memref<1x1xf32, #tpu.memory_space<vmem>>, %arg16: memref<2x12xf32, #tpu.memory_space<vmem>>, %arg17: memref<16x128xf32, #tpu.memory_space<vmem>>) attributes {dimension_semantics = [], scalar_prefetch = 0 : i64, scratch_operands = 1 : i64, tpu.core_type = #tpu.core_type<tc>} {
    %c0 = arith.constant 0 : index
    %c0_0 = arith.constant 0 : index
    %0 = vector.load %arg0[%c0, %c0_0] : memref<32x1xf32, #tpu.memory_space<vmem>>, vector<32x1xf32>
    %c0_1 = arith.constant 0 : index
    %c0_2 = arith.constant 0 : index
    %1 = vector.load %arg1[%c0_1, %c0_2] : memref<1x64xf32, #tpu.memory_space<vmem>>, vector<1x64xf32>
    %2 = vector.broadcast %0 : vector<32x1xf32> to vector<32x64xf32>
    %3 = vector.broadcast %1 : vector<1x64xf32> to vector<32x64xf32>
    %4 = arith.mulf %2, %3 : vector<32x64xf32>
    %c0_3 = arith.constant 0 : index
    %c0_4 = arith.constant 0 : index
    %5 = vector.load %arg2[%c0_3, %c0_4] : memref<1x64xf32, #tpu.memory_space<vmem>>, vector<1x64xf32>
    %6 = vector.broadcast %5 : vector<1x64xf32> to vector<32x64xf32>
    %7 = arith.addf %4, %6 : vector<32x64xf32>
    %cst = arith.constant 0.000000e+00 : f32
    %8 = vector.broadcast %cst : f32 to vector<32x64xf32>
    %9 = arith.maximumf %7, %8 : vector<32x64xf32>
    %10 = tpu.iota {dimensions = array<i32: 1>} : vector<32x16xi32>
    %c0_5 = arith.constant 0 : index
    %c0_6 = arith.constant 0 : index
    %11 = vector.load %arg5[%c0_5, %c0_6] : memref<32x1xi32, #tpu.memory_space<vmem>>, vector<32x1xi32>
    %12 = vector.broadcast %11 : vector<32x1xi32> to vector<32x16xi32>
    %13 = arith.cmpi eq, %10, %12 : vector<32x16xi32>
    %14 = arith.extui %13 : vector<32x16xi1> to vector<32x16xi32>
    %15 = arith.sitofp %14 : vector<32x16xi32> to vector<32x16xf32>
    %c0_7 = arith.constant 0 : index
    %c0_8 = arith.constant 0 : index
    %16 = vector.load %arg7[%c0_7, %c0_8] : memref<16x8xf32, #tpu.memory_space<vmem>>, vector<16x8xf32>
    %cst_9 = arith.constant dense<0.000000e+00> : vector<32x8xf32>
    %17 = tpu.matmul %15, %16, %cst_9 {dimension_numbers = #tpu.dot_dimension_numbers<[1], [0], [0], [1], [0, 0, 1, 1], [], []>} : vector<32x16xf32>, vector<16x8xf32>, vector<32x8xf32> -> vector<32x8xf32>
    %cst_10 = arith.constant 0.000000e+00 : f32
    %18 = vector.broadcast %cst_10 : f32 to vector<32x128xf32>
    %c0_11 = arith.constant 0 : index
    %c0_12 = arith.constant 0 : index
    %19 = vector.load %arg3[%c0_11, %c0_12] : memref<64x1024xf32, #tpu.memory_space<vmem>>, vector<64x128xf32>
    %cst_13 = arith.constant dense<0.000000e+00> : vector<32x128xf32>
    %20 = tpu.matmul %9, %19, %cst_13 {dimension_numbers = #tpu.dot_dimension_numbers<[1], [0], [0], [1], [0, 0, 1, 1], [], []>} : vector<32x64xf32>, vector<64x128xf32>, vector<32x128xf32> -> vector<32x128xf32>
    %c0_14 = arith.constant 0 : index
    %c0_15 = arith.constant 0 : index
    %21 = vector.load %arg4[%c0_14, %c0_15] : memref<1x1024xf32, #tpu.memory_space<vmem>>, vector<1x128xf32>
    %22 = vector.broadcast %21 : vector<1x128xf32> to vector<32x128xf32>
    %23 = arith.addf %20, %22 : vector<32x128xf32>
    %24 = vector.extract_strided_slice %17 {offsets = [0, 0], sizes = [32, 1], strides = [1, 1]} : vector<32x8xf32> to vector<32x1xf32>
    %25 = vector.broadcast %24 : vector<32x1xf32> to vector<32x128xf32>
    %26 = arith.mulf %25, %23 : vector<32x128xf32>
    %27 = arith.addf %18, %26 : vector<32x128xf32>
    %c0_16 = arith.constant 0 : index
    %c128 = arith.constant 128 : index
    %28 = vector.load %arg3[%c0_16, %c128] : memref<64x1024xf32, #tpu.memory_space<vmem>>, vector<64x128xf32>
    %cst_17 = arith.constant dense<0.000000e+00> : vector<32x128xf32>
    %29 = tpu.matmul %9, %28, %cst_17 {dimension_numbers = #tpu.dot_dimension_numbers<[1], [0], [0], [1], [0, 0, 1, 1], [], []>} : vector<32x64xf32>, vector<64x128xf32>, vector<32x128xf32> -> vector<32x128xf32>
    %c0_18 = arith.constant 0 : index
    %c128_19 = arith.constant 128 : index
    %30 = vector.load %arg4[%c0_18, %c128_19] : memref<1x1024xf32, #tpu.memory_space<vmem>>, vector<1x128xf32>
    %31 = vector.broadcast %30 : vector<1x128xf32> to vector<32x128xf32>
    %32 = arith.addf %29, %31 : vector<32x128xf32>
    %33 = vector.extract_strided_slice %17 {offsets = [0, 1], sizes = [32, 1], strides = [1, 1]} : vector<32x8xf32> to vector<32x1xf32>
    %34 = vector.broadcast %33 : vector<32x1xf32> to vector<32x128xf32>
    %35 = arith.mulf %34, %32 : vector<32x128xf32>
    %36 = arith.addf %27, %35 : vector<32x128xf32>
    %c0_20 = arith.constant 0 : index
    %c256 = arith.constant 256 : index
    %37 = vector.load %arg3[%c0_20, %c256] : memref<64x1024xf32, #tpu.memory_space<vmem>>, vector<64x128xf32>
    %cst_21 = arith.constant dense<0.000000e+00> : vector<32x128xf32>
    %38 = tpu.matmul %9, %37, %cst_21 {dimension_numbers = #tpu.dot_dimension_numbers<[1], [0], [0], [1], [0, 0, 1, 1], [], []>} : vector<32x64xf32>, vector<64x128xf32>, vector<32x128xf32> -> vector<32x128xf32>
    %c0_22 = arith.constant 0 : index
    %c256_23 = arith.constant 256 : index
    %39 = vector.load %arg4[%c0_22, %c256_23] : memref<1x1024xf32, #tpu.memory_space<vmem>>, vector<1x128xf32>
    %40 = vector.broadcast %39 : vector<1x128xf32> to vector<32x128xf32>
    %41 = arith.addf %38, %40 : vector<32x128xf32>
    %42 = vector.extract_strided_slice %17 {offsets = [0, 2], sizes = [32, 1], strides = [1, 1]} : vector<32x8xf32> to vector<32x1xf32>
    %43 = vector.broadcast %42 : vector<32x1xf32> to vector<32x128xf32>
    %44 = arith.mulf %43, %41 : vector<32x128xf32>
    %45 = arith.addf %36, %44 : vector<32x128xf32>
    %c0_24 = arith.constant 0 : index
    %c384 = arith.constant 384 : index
    %46 = vector.load %arg3[%c0_24, %c384] : memref<64x1024xf32, #tpu.memory_space<vmem>>, vector<64x128xf32>
    %cst_25 = arith.constant dense<0.000000e+00> : vector<32x128xf32>
    %47 = tpu.matmul %9, %46, %cst_25 {dimension_numbers = #tpu.dot_dimension_numbers<[1], [0], [0], [1], [0, 0, 1, 1], [], []>} : vector<32x64xf32>, vector<64x128xf32>, vector<32x128xf32> -> vector<32x128xf32>
    %c0_26 = arith.constant 0 : index
    %c384_27 = arith.constant 384 : index
    %48 = vector.load %arg4[%c0_26, %c384_27] : memref<1x1024xf32, #tpu.memory_space<vmem>>, vector<1x128xf32>
    %49 = vector.broadcast %48 : vector<1x128xf32> to vector<32x128xf32>
    %50 = arith.addf %47, %49 : vector<32x128xf32>
    %51 = vector.extract_strided_slice %17 {offsets = [0, 3], sizes = [32, 1], strides = [1, 1]} : vector<32x8xf32> to vector<32x1xf32>
    %52 = vector.broadcast %51 : vector<32x1xf32> to vector<32x128xf32>
    %53 = arith.mulf %52, %50 : vector<32x128xf32>
    %54 = arith.addf %45, %53 : vector<32x128xf32>
    %c0_28 = arith.constant 0 : index
    %c512 = arith.constant 512 : index
    %55 = vector.load %arg3[%c0_28, %c512] : memref<64x1024xf32, #tpu.memory_space<vmem>>, vector<64x128xf32>
    %cst_29 = arith.constant dense<0.000000e+00> : vector<32x128xf32>
    %56 = tpu.matmul %9, %55, %cst_29 {dimension_numbers = #tpu.dot_dimension_numbers<[1], [0], [0], [1], [0, 0, 1, 1], [], []>} : vector<32x64xf32>, vector<64x128xf32>, vector<32x128xf32> -> vector<32x128xf32>
    %c0_30 = arith.constant 0 : index
    %c512_31 = arith.constant 512 : index
    %57 = vector.load %arg4[%c0_30, %c512_31] : memref<1x1024xf32, #tpu.memory_space<vmem>>, vector<1x128xf32>
    %58 = vector.broadcast %57 : vector<1x128xf32> to vector<32x128xf32>
    %59 = arith.addf %56, %58 : vector<32x128xf32>
    %60 = vector.extract_strided_slice %17 {offsets = [0, 4], sizes = [32, 1], strides = [1, 1]} : vector<32x8xf32> to vector<32x1xf32>
    %61 = vector.broadcast %60 : vector<32x1xf32> to vector<32x128xf32>
    %62 = arith.mulf %61, %59 : vector<32x128xf32>
    %63 = arith.addf %54, %62 : vector<32x128xf32>
    %c0_32 = arith.constant 0 : index
    %c640 = arith.constant 640 : index
    %64 = vector.load %arg3[%c0_32, %c640] : memref<64x1024xf32, #tpu.memory_space<vmem>>, vector<64x128xf32>
    %cst_33 = arith.constant dense<0.000000e+00> : vector<32x128xf32>
    %65 = tpu.matmul %9, %64, %cst_33 {dimension_numbers = #tpu.dot_dimension_numbers<[1], [0], [0], [1], [0, 0, 1, 1], [], []>} : vector<32x64xf32>, vector<64x128xf32>, vector<32x128xf32> -> vector<32x128xf32>
    %c0_34 = arith.constant 0 : index
    %c640_35 = arith.constant 640 : index
    %66 = vector.load %arg4[%c0_34, %c640_35] : memref<1x1024xf32, #tpu.memory_space<vmem>>, vector<1x128xf32>
    %67 = vector.broadcast %66 : vector<1x128xf32> to vector<32x128xf32>
    %68 = arith.addf %65, %67 : vector<32x128xf32>
    %69 = vector.extract_strided_slice %17 {offsets = [0, 5], sizes = [32, 1], strides = [1, 1]} : vector<32x8xf32> to vector<32x1xf32>
    %70 = vector.broadcast %69 : vector<32x1xf32> to vector<32x128xf32>
    %71 = arith.mulf %70, %68 : vector<32x128xf32>
    %72 = arith.addf %63, %71 : vector<32x128xf32>
    %c0_36 = arith.constant 0 : index
    %c768 = arith.constant 768 : index
    %73 = vector.load %arg3[%c0_36, %c768] : memref<64x1024xf32, #tpu.memory_space<vmem>>, vector<64x128xf32>
    %cst_37 = arith.constant dense<0.000000e+00> : vector<32x128xf32>
    %74 = tpu.matmul %9, %73, %cst_37 {dimension_numbers = #tpu.dot_dimension_numbers<[1], [0], [0], [1], [0, 0, 1, 1], [], []>} : vector<32x64xf32>, vector<64x128xf32>, vector<32x128xf32> -> vector<32x128xf32>
    %c0_38 = arith.constant 0 : index
    %c768_39 = arith.constant 768 : index
    %75 = vector.load %arg4[%c0_38, %c768_39] : memref<1x1024xf32, #tpu.memory_space<vmem>>, vector<1x128xf32>
    %76 = vector.broadcast %75 : vector<1x128xf32> to vector<32x128xf32>
    %77 = arith.addf %74, %76 : vector<32x128xf32>
    %78 = vector.extract_strided_slice %17 {offsets = [0, 6], sizes = [32, 1], strides = [1, 1]} : vector<32x8xf32> to vector<32x1xf32>
    %79 = vector.broadcast %78 : vector<32x1xf32> to vector<32x128xf32>
    %80 = arith.mulf %79, %77 : vector<32x128xf32>
    %81 = arith.addf %72, %80 : vector<32x128xf32>
    %c0_40 = arith.constant 0 : index
    %c896 = arith.constant 896 : index
    %82 = vector.load %arg3[%c0_40, %c896] : memref<64x1024xf32, #tpu.memory_space<vmem>>, vector<64x128xf32>
    %cst_41 = arith.constant dense<0.000000e+00> : vector<32x128xf32>
    %83 = tpu.matmul %9, %82, %cst_41 {dimension_numbers = #tpu.dot_dimension_numbers<[1], [0], [0], [1], [0, 0, 1, 1], [], []>} : vector<32x64xf32>, vector<64x128xf32>, vector<32x128xf32> -> vector<32x128xf32>
    %c0_42 = arith.constant 0 : index
    %c896_43 = arith.constant 896 : index
    %84 = vector.load %arg4[%c0_42, %c896_43] : memref<1x1024xf32, #tpu.memory_space<vmem>>, vector<1x128xf32>
    %85 = vector.broadcast %84 : vector<1x128xf32> to vector<32x128xf32>
    %86 = arith.addf %83, %85 : vector<32x128xf32>
    %87 = vector.extract_strided_slice %17 {offsets = [0, 7], sizes = [32, 1], strides = [1, 1]} : vector<32x8xf32> to vector<32x1xf32>
    %88 = vector.broadcast %87 : vector<32x1xf32> to vector<32x128xf32>
    %89 = arith.mulf %88, %86 : vector<32x128xf32>
    %90 = arith.addf %81, %89 : vector<32x128xf32>
    %91 = tpu.iota {dimensions = array<i32: 0>} : vector<16x32xi32>
    %c0_44 = arith.constant 0 : index
    %c0_45 = arith.constant 0 : index
    %92 = vector.load %arg6[%c0_44, %c0_45] : memref<1x32xi32, #tpu.memory_space<vmem>>, vector<1x32xi32>
    %93 = vector.broadcast %92 : vector<1x32xi32> to vector<16x32xi32>
    %94 = arith.cmpi eq, %91, %93 : vector<16x32xi32>
    %95 = arith.extui %94 : vector<16x32xi1> to vector<16x32xi32>
    %96 = arith.sitofp %95 : vector<16x32xi32> to vector<16x32xf32>
    %cst_46 = arith.constant dense<0.000000e+00> : vector<16x128xf32>
    %97 = tpu.matmul %96, %90, %cst_46 {dimension_numbers = #tpu.dot_dimension_numbers<[1], [0], [0], [1], [0, 0, 1, 1], [], []>} : vector<16x32xf32>, vector<32x128xf32>, vector<16x128xf32> -> vector<16x128xf32>
    %c0_47 = arith.constant 0 : index
    %c0_48 = arith.constant 0 : index
    %98 = vector.load %arg7[%c0_47, %c0_48] : memref<16x8xf32, #tpu.memory_space<vmem>>, vector<16x8xf32>
    %c0_49 = arith.constant 0 : index
    %c0_50 = arith.constant 0 : index
    %99 = vector.load %arg8[%c0_49, %c0_50] : memref<8x128xf32, #tpu.memory_space<vmem>>, vector<8x128xf32>
    %cst_51 = arith.constant dense<0.000000e+00> : vector<16x128xf32>
    %100 = tpu.matmul %98, %99, %cst_51 {dimension_numbers = #tpu.dot_dimension_numbers<[1], [0], [0], [1], [0, 0, 1, 1], [], []>} : vector<16x8xf32>, vector<8x128xf32>, vector<16x128xf32> -> vector<16x128xf32>
    %101 = arith.addf %97, %100 : vector<16x128xf32>
    %c0_52 = arith.constant 0 : index
    %c0_53 = arith.constant 0 : index
    %102 = vector.load %arg9[%c0_52, %c0_53] : memref<1x128xf32, #tpu.memory_space<vmem>>, vector<1x128xf32>
    %103 = vector.broadcast %102 : vector<1x128xf32> to vector<16x128xf32>
    %104 = arith.addf %101, %103 : vector<16x128xf32>
    %cst_54 = arith.constant 0.000000e+00 : f32
    %105 = vector.broadcast %cst_54 : f32 to vector<16x128xf32>
    %106 = arith.maximumf %104, %105 : vector<16x128xf32>
    %c0_55 = arith.constant 0 : index
    %c0_56 = arith.constant 0 : index
    %107 = vector.load %arg17[%c0_55, %c0_56] : memref<16x128xf32, #tpu.memory_space<vmem>>, vector<16x128xf32>
    tpu.vector_store %arg17[%c0_55, %c0_56], %106 {strides = array<i32>} : memref<16x128xf32, #tpu.memory_space<vmem>>, vector<16x128xf32>,
    %cst_57 = arith.constant 0.000000e+00 : f32
    %108 = vector.broadcast %cst_57 : f32 to vector<2x76xf32>
    %c0_58 = arith.constant 0 : index
    %c0_59 = arith.constant 0 : index
    %109 = tpu.strided_load %arg17[%c0_58, %c0_59] {strides = array<i32: 8, 1>} : memref<16x128xf32, #tpu.memory_space<vmem>>, vector<2x128xf32>
    %c0_60 = arith.constant 0 : index
    %c0_61 = arith.constant 0 : index
    %110 = vector.load %arg10[%c0_60, %c0_61] : memref<1024x76xf32, #tpu.memory_space<vmem>>, vector<128x76xf32>
    %cst_62 = arith.constant dense<0.000000e+00> : vector<2x76xf32>
    %111 = tpu.matmul %109, %110, %cst_62 {dimension_numbers = #tpu.dot_dimension_numbers<[1], [0], [0], [1], [0, 0, 1, 1], [], []>} : vector<2x128xf32>, vector<128x76xf32>, vector<2x76xf32> -> vector<2x76xf32>
    %112 = arith.addf %108, %111 : vector<2x76xf32>
    %c1 = arith.constant 1 : index
    %c0_63 = arith.constant 0 : index
    %113 = tpu.strided_load %arg17[%c1, %c0_63] {strides = array<i32: 8, 1>} : memref<16x128xf32, #tpu.memory_space<vmem>>, vector<2x128xf32>
    %c128_64 = arith.constant 128 : index
    %c0_65 = arith.constant 0 : index
    %114 = vector.load %arg10[%c128_64, %c0_65] : memref<1024x76xf32, #tpu.memory_space<vmem>>, vector<128x76xf32>
    %cst_66 = arith.constant dense<0.000000e+00> : vector<2x76xf32>
    %115 = tpu.matmul %113, %114, %cst_66 {dimension_numbers = #tpu.dot_dimension_numbers<[1], [0], [0], [1], [0, 0, 1, 1], [], []>} : vector<2x128xf32>, vector<128x76xf32>, vector<2x76xf32> -> vector<2x76xf32>
    %116 = arith.addf %112, %115 : vector<2x76xf32>
    %c2 = arith.constant 2 : index
    %c0_67 = arith.constant 0 : index
    %117 = tpu.strided_load %arg17[%c2, %c0_67] {strides = array<i32: 8, 1>} : memref<16x128xf32, #tpu.memory_space<vmem>>, vector<2x128xf32>
    %c256_68 = arith.constant 256 : index
    %c0_69 = arith.constant 0 : index
    %118 = vector.load %arg10[%c256_68, %c0_69] : memref<1024x76xf32, #tpu.memory_space<vmem>>, vector<128x76xf32>
    %cst_70 = arith.constant dense<0.000000e+00> : vector<2x76xf32>
    %119 = tpu.matmul %117, %118, %cst_70 {dimension_numbers = #tpu.dot_dimension_numbers<[1], [0], [0], [1], [0, 0, 1, 1], [], []>} : vector<2x128xf32>, vector<128x76xf32>, vector<2x76xf32> -> vector<2x76xf32>
    %120 = arith.addf %116, %119 : vector<2x76xf32>
    %c3 = arith.constant 3 : index
    %c0_71 = arith.constant 0 : index
    %121 = tpu.strided_load %arg17[%c3, %c0_71] {strides = array<i32: 8, 1>} : memref<16x128xf32, #tpu.memory_space<vmem>>, vector<2x128xf32>
    %c384_72 = arith.constant 384 : index
    %c0_73 = arith.constant 0 : index
    %122 = vector.load %arg10[%c384_72, %c0_73] : memref<1024x76xf32, #tpu.memory_space<vmem>>, vector<128x76xf32>
    %cst_74 = arith.constant dense<0.000000e+00> : vector<2x76xf32>
    %123 = tpu.matmul %121, %122, %cst_74 {dimension_numbers = #tpu.dot_dimension_numbers<[1], [0], [0], [1], [0, 0, 1, 1], [], []>} : vector<2x128xf32>, vector<128x76xf32>, vector<2x76xf32> -> vector<2x76xf32>
    %124 = arith.addf %120, %123 : vector<2x76xf32>
    %c4 = arith.constant 4 : index
    %c0_75 = arith.constant 0 : index
    %125 = tpu.strided_load %arg17[%c4, %c0_75] {strides = array<i32: 8, 1>} : memref<16x128xf32, #tpu.memory_space<vmem>>, vector<2x128xf32>
    %c512_76 = arith.constant 512 : index
    %c0_77 = arith.constant 0 : index
    %126 = vector.load %arg10[%c512_76, %c0_77] : memref<1024x76xf32, #tpu.memory_space<vmem>>, vector<128x76xf32>
    %cst_78 = arith.constant dense<0.000000e+00> : vector<2x76xf32>
    %127 = tpu.matmul %125, %126, %cst_78 {dimension_numbers = #tpu.dot_dimension_numbers<[1], [0], [0], [1], [0, 0, 1, 1], [], []>} : vector<2x128xf32>, vector<128x76xf32>, vector<2x76xf32> -> vector<2x76xf32>
    %128 = arith.addf %124, %127 : vector<2x76xf32>
    %c5 = arith.constant 5 : index
    %c0_79 = arith.constant 0 : index
    %129 = tpu.strided_load %arg17[%c5, %c0_79] {strides = array<i32: 8, 1>} : memref<16x128xf32, #tpu.memory_space<vmem>>, vector<2x128xf32>
    %c640_80 = arith.constant 640 : index
    %c0_81 = arith.constant 0 : index
    %130 = vector.load %arg10[%c640_80, %c0_81] : memref<1024x76xf32, #tpu.memory_space<vmem>>, vector<128x76xf32>
    %cst_82 = arith.constant dense<0.000000e+00> : vector<2x76xf32>
    %131 = tpu.matmul %129, %130, %cst_82 {dimension_numbers = #tpu.dot_dimension_numbers<[1], [0], [0], [1], [0, 0, 1, 1], [], []>} : vector<2x128xf32>, vector<128x76xf32>, vector<2x76xf32> -> vector<2x76xf32>
    %132 = arith.addf %128, %131 : vector<2x76xf32>
    %c6 = arith.constant 6 : index
    %c0_83 = arith.constant 0 : index
    %133 = tpu.strided_load %arg17[%c6, %c0_83] {strides = array<i32: 8, 1>} : memref<16x128xf32, #tpu.memory_space<vmem>>, vector<2x128xf32>
    %c768_84 = arith.constant 768 : index
    %c0_85 = arith.constant 0 : index
    %134 = vector.load %arg10[%c768_84, %c0_85] : memref<1024x76xf32, #tpu.memory_space<vmem>>, vector<128x76xf32>
    %cst_86 = arith.constant dense<0.000000e+00> : vector<2x76xf32>
    %135 = tpu.matmul %133, %134, %cst_86 {dimension_numbers = #tpu.dot_dimension_numbers<[1], [0], [0], [1], [0, 0, 1, 1], [], []>} : vector<2x128xf32>, vector<128x76xf32>, vector<2x76xf32> -> vector<2x76xf32>
    %136 = arith.addf %132, %135 : vector<2x76xf32>
    %c7 = arith.constant 7 : index
    %c0_87 = arith.constant 0 : index
    %137 = tpu.strided_load %arg17[%c7, %c0_87] {strides = array<i32: 8, 1>} : memref<16x128xf32, #tpu.memory_space<vmem>>, vector<2x128xf32>
    %c896_88 = arith.constant 896 : index
    %c0_89 = arith.constant 0 : index
    %138 = vector.load %arg10[%c896_88, %c0_89] : memref<1024x76xf32, #tpu.memory_space<vmem>>, vector<128x76xf32>
    %cst_90 = arith.constant dense<0.000000e+00> : vector<2x76xf32>
    %139 = tpu.matmul %137, %138, %cst_90 {dimension_numbers = #tpu.dot_dimension_numbers<[1], [0], [0], [1], [0, 0, 1, 1], [], []>} : vector<2x128xf32>, vector<128x76xf32>, vector<2x76xf32> -> vector<2x76xf32>
    %140 = arith.addf %136, %139 : vector<2x76xf32>
    %c0_91 = arith.constant 0 : index
    %c0_92 = arith.constant 0 : index
    %141 = vector.load %arg11[%c0_91, %c0_92] : memref<1x76xf32, #tpu.memory_space<vmem>>, vector<1x76xf32>
    %142 = vector.broadcast %141 : vector<1x76xf32> to vector<2x76xf32>
    %143 = arith.addf %140, %142 : vector<2x76xf32>
    %144 = vector.extract_strided_slice %143 {offsets = [0, 0], sizes = [2, 64], strides = [1, 1]} : vector<2x76xf32> to vector<2x64xf32>
    %cst_93 = arith.constant 0.000000e+00 : f32
    %145 = vector.broadcast %cst_93 : f32 to vector<2x64xf32>
    %146 = arith.maximumf %144, %145 : vector<2x64xf32>
    %147 = vector.extract_strided_slice %143 {offsets = [0, 64], sizes = [2, 12], strides = [1, 1]} : vector<2x76xf32> to vector<2x12xf32>
    %cst_94 = arith.constant 0.000000e+00 : f32
    %148 = vector.broadcast %cst_94 : f32 to vector<2x12xf32>
    %149 = arith.maximumf %147, %148 : vector<2x12xf32>
    %c0_95 = arith.constant 0 : index
    %c0_96 = arith.constant 0 : index
    %150 = vector.load %arg12[%c0_95, %c0_96] : memref<64x64xf32, #tpu.memory_space<vmem>>, vector<64x64xf32>
    %cst_97 = arith.constant dense<0.000000e+00> : vector<2x64xf32>
    %151 = tpu.matmul %146, %150, %cst_97 {dimension_numbers = #tpu.dot_dimension_numbers<[1], [0], [0], [1], [0, 0, 1, 1], [], []>} : vector<2x64xf32>, vector<64x64xf32>, vector<2x64xf32> -> vector<2x64xf32>
    %c0_98 = arith.constant 0 : index
    %c0_99 = arith.constant 0 : index
    %152 = vector.load %arg13[%c0_98, %c0_99] : memref<1x64xf32, #tpu.memory_space<vmem>>, vector<1x64xf32>
    %153 = vector.broadcast %152 : vector<1x64xf32> to vector<2x64xf32>
    %154 = arith.addf %151, %153 : vector<2x64xf32>
    %cst_100 = arith.constant 0.000000e+00 : f32
    %155 = vector.broadcast %cst_100 : f32 to vector<2x64xf32>
    %156 = arith.maximumf %154, %155 : vector<2x64xf32>
    %c0_101 = arith.constant 0 : index
    %c0_102 = arith.constant 0 : index
    %157 = vector.load %arg14[%c0_101, %c0_102] : memref<1x64xf32, #tpu.memory_space<vmem>>, vector<1x64xf32>
    %158 = vector.broadcast %157 : vector<1x64xf32> to vector<2x64xf32>
    %159 = arith.mulf %156, %158 : vector<2x64xf32>
    %cst_103 = arith.constant dense<0.000000e+00> : vector<2xf32>
    %160 = vector.multi_reduction <add>, %159, %cst_103 [1] : vector<2x64xf32> to vector<2xf32>
    %161 = vector.shape_cast %160 : vector<2xf32> to vector<2x1xf32>
    %c0_104 = arith.constant 0 : index
    %c0_105 = arith.constant 0 : index
    %162 = vector.load %arg15[%c0_104, %c0_105] : memref<1x1xf32, #tpu.memory_space<vmem>>, vector<1x1xf32>
    %163 = vector.broadcast %162 : vector<1x1xf32> to vector<2x1xf32>
    %164 = arith.addf %161, %163 : vector<2x1xf32>
    %165 = vector.extract_strided_slice %149 {offsets = [0, 0], sizes = [2, 6], strides = [1, 1]} : vector<2x12xf32> to vector<2x6xf32>
    %cst_106 = arith.constant dense<0.000000e+00> : vector<2xf32>
    %166 = vector.multi_reduction <add>, %165, %cst_106 [1] : vector<2x6xf32> to vector<2xf32>
    %167 = vector.shape_cast %166 : vector<2xf32> to vector<2x1xf32>
    %cst_107 = arith.constant 6.000000e+00 : f32
    %168 = vector.broadcast %cst_107 : f32 to vector<2x1xf32>
    %169 = arith.divf %167, %168 : vector<2x1xf32>
    %170 = vector.shape_cast %169 : vector<2x1xf32> to vector<2x1xf32>
    %171 = vector.broadcast %170 : vector<2x1xf32> to vector<2x6xf32>
    %172 = vector.extract_strided_slice %149 {offsets = [0, 6], sizes = [2, 6], strides = [1, 1]} : vector<2x12xf32> to vector<2x6xf32>
    %cst_108 = arith.constant dense<0.000000e+00> : vector<2xf32>
    %173 = vector.multi_reduction <add>, %172, %cst_108 [1] : vector<2x6xf32> to vector<2xf32>
    %174 = vector.shape_cast %173 : vector<2xf32> to vector<2x1xf32>
    %cst_109 = arith.constant 6.000000e+00 : f32
    %175 = vector.broadcast %cst_109 : f32 to vector<2x1xf32>
    %176 = arith.divf %174, %175 : vector<2x1xf32>
    %177 = vector.shape_cast %176 : vector<2x1xf32> to vector<2x1xf32>
    %178 = vector.broadcast %177 : vector<2x1xf32> to vector<2x6xf32>
    %179 = tpu.concatenate %171, %178 in 1 : vector<2x6xf32>, vector<2x6xf32> -> vector<2x12xf32>
    %180 = vector.broadcast %164 : vector<2x1xf32> to vector<2x12xf32>
    %181 = arith.addf %180, %149 : vector<2x12xf32>
    %182 = arith.subf %181, %179 : vector<2x12xf32>
    %c0_110 = arith.constant 0 : index
    %c0_111 = arith.constant 0 : index
    %183 = vector.load %arg16[%c0_110, %c0_111] : memref<2x12xf32, #tpu.memory_space<vmem>>, vector<2x12xf32>
    tpu.vector_store %arg16[%c0_110, %c0_111], %182 {strides = array<i32>} : memref<2x12xf32, #tpu.memory_space<vmem>>, vector<2x12xf32>,
    return
  }
}

</mosaic_0001>

<bundles_post_ra>
// kernel: bhs_nn_forward.1
= control target key start
LH: loop header
LB: loop body
LE: loop exit
PB: predicated region body
PF: predicated region fallthrough
CT: control target
= control target key end

     0   :  { %v3166_v0 = vmov 0   ;;  %v105_v21 = vlaneseq  ;;  %vm137_vm0 = vcmask 130048   ;;  %v4386_v25 = vmov 0.0   ;;  %s3176_s19 = smov 58   ;;  %s3177_s20 = smov 64   ;;  %s4368_s5 = inlined_call_operand.vmem [shape: s32[32,1], index: 5, kind: input, shape index: {}]   ;;  %s4369_s3 = inlined_call_operand.vmem [shape: f32[64,1024], index: 3, kind: input, shape index: {}]   ;;  %s4370_s7 = inlined_call_operand.vmem [shape: f32[16,8], index: 7, kind: input, shape index: {}]   ;;  %s4371_s0 = inlined_call_operand.vmem [shape: f32[32,1], index: 0, kind: input, shape index: {}]   ;;  %s4372_s1 = inlined_call_operand.vmem [shape: f32[1,64], index: 1, kind: input, shape index: {}]   ;;  %s4373_s2 = inlined_call_operand.vmem [shape: f32[1,64], index: 2, kind: input, shape index: {}]   ;;  %s4374_s8 = inlined_call_operand.vmem [shape: f32[8,128], index: 8, kind: input, shape index: {}]   ;;  %s4375_s6 = inlined_call_operand.vmem [shape: s32[1,32], index: 6, kind: input, shape index: {}]   ;;  %s4376_s10 = inlined_call_operand.vmem [shape: f32[1024,76], index: 10, kind: input, shape index: {}]   ;;  %s4377_s4 = inlined_call_operand.vmem [shape: f32[1,1024], index: 4, kind: input, shape index: {}]   ;;  %s4378_s9 = inlined_call_operand.vmem [shape: f32[1,128], index: 9, kind: input, shape index: {}]   ;;  %s4379_s12 = inlined_call_operand.vmem [shape: f32[64,64], index: 12, kind: input, shape index: {}]   ;;  %s4380_s11 = inlined_call_operand.vmem [shape: f32[1,76], index: 11, kind: input, shape index: {}]   ;;  %s4381_s15 = inlined_call_operand.<no memory space> [shape: f32[1,1], index: 15, kind: input, shape index: {}]   ;;  %s4382_s13 = inlined_call_operand.vmem [shape: f32[1,64], index: 13, kind: input, shape index: {}]   ;;  %s4383_s14 = inlined_call_operand.vmem [shape: f32[1,64], index: 14, kind: input, shape index: {}]   ;;  %s4384_s16 = inlined_call_operand.vmem [shape: f32[2,12], index: 16, kind: output, shape index: {}]  }
   0x1   :  { %4389 = sst [smem:[#allocation5_spill]] %s4368_s5  ;;  %3134 = vset.pattern.permute.xlu0 %v3166_v0  ;;  %3135 = vset.pattern.permute.xlu1 %v3166_v0  ;;  %v242_v5 = vld [vmem:[%s4369_s3 + $0x1c0] sm:$0xff]  ;;  %v3286_v7 = vld [vmem:[%s4370_s7 + $0x8] sm:$0xff]  ;;  %v57_v14 = vld [vmem:[%s4371_s0 + $0x10] sm:$0xff]  ;;  %vm250_vm5 = vcmask 523264   ;;  %vm1259_vm6 = vcmask 64512  }
   0x2   :  { %s4390_s23 = sld [smem:[#allocation5_spill]]  ;;  %2631 = vmatprep.subr.mxu1 %v242_v5  ;;  %v241_v6 = vld [vmem:[%s4369_s3 + $0x180] sm:$0xff]  ;;  %2621 = vmatprep.subr.mxu0 %v3286_v7  ;;  %v56_v11 = vld [vmem:[%s4371_s0 + $0x8] sm:$0xff]  ;;  %v58_v15 = vld [vmem:[%s4371_s0 + $0x18] sm:$0xff]  ;;  %v106_v22 = vand.u32 127, %v105_v21  ;;  %vm1341_vm7 = vcmask 261120  }
   0x3   :  { %2632 = vmatpush3.msra.mxu1 %v242_v5  ;;  %v3292_v8 = vld [vmem:[%s4370_s7] sm:$0xff]  ;;  %2622 = vmatpush3.msra.mxu0 %v3286_v7  ;;  %v383_v12 = vld [vmem:[%s4369_s3 + $0x1c8] sm:$0xff]  ;;  %v3333_v20 = vld [vmem:[%s4369_s3 + $0x1d0] sm:$0xff]  ;;  %vm3175_vm10 = vmmov 0   ;;  %vm2266_vm11 = vcmask 41984   ;;  %vm2251_vm12 = vcmask 517120  }
   0x4   :  { %v240_v9 = vld [vmem:[%s4369_s3 + $0x140] sm:$0xff]  ;;  %2633 = vmatprep.subr.mxu1 %v241_v6  ;;  %2623 = vmatprep.subr.mxu0 %v3292_v8  ;;  %v382_v31 = vld [vmem:[%s4369_s3 + $0x188] sm:$0xff]  ;;  %v506_v53 = vld [vmem:[%s4369_s3 + $0x190] sm:$0xff]  ;;  %vm2279_vm13 = vcmask 48128   ;;  %vm2296_vm14 = vcmask 91136  }
   0x5   :  { %v55_v10 = vld [vmem:[%s4371_s0] sm:$0xff]  ;;  %2634 = vmatpush3.msra.mxu1 %v241_v6  ;;  %2624 = vmatpush3.msra.mxu0 %v3292_v8  ;;  %v381_v37 = vld [vmem:[%s4369_s3 + $0x148] sm:$0xff]  ;;  %v505_v57 = vld [vmem:[%s4369_s3 + $0x150] sm:$0xff] }
   0x6   :  { %2635 = vmatprep.subr.mxu1 %v240_v9  ;;  %v239_v13 = vld [vmem:[%s4369_s3 + $0x100] sm:$0xff]  ;;  %2653 = vmatprep.subr.mxu0 %v383_v12  ;;  %v380_v40 = vld [vmem:[%s4369_s3 + $0x108] sm:$0xff]  ;;  %v504_v59 = vld [vmem:[%s4369_s3 + $0x110] sm:$0xff] }
   0x7   :  { %2636 = vmatpush3.msra.mxu1 %v240_v9  ;;  %v238_v16 = vld [vmem:[%s4369_s3 + $0xc0] sm:$0xff]  ;;  %v379_v45 = vld [vmem:[%s4369_s3 + $0xc8] sm:$0xff]  ;;  %v631_v60 = vld [vmem:[%s4369_s3 + $0x1d8] sm:$0xff] }
   0x8   :  { %v107_v1 = vld [vmem:[%s4390_s23] sm:$0xff]  ;;  %v109_v2 = vld [vmem:[%s4390_s23 + $0x10] sm:$0xff]  ;;  %v108_v3 = vld [vmem:[%s4390_s23 + $0x8] sm:$0xff]  ;;  %2637 = vmatprep.subr.mxu1 %v239_v13 }
   0x9   :  { %112 = vperm.xlu0 %3134, %v107_v1   ;;  %118 = vperm.xlu1 %3135, %v109_v2   ;;  %v110_v4 = vld [vmem:[%s4390_s23 + $0x18] sm:$0xff]  ;;  %v237_v17 = vld [vmem:[%s4369_s3 + $0x80] sm:$0xff]  ;;  %v378_v50 = vld [vmem:[%s4369_s3 + $0x88] sm:$0xff] }
   0xa   :  { %2638 = vmatpush3.msra.mxu1 %v239_v13  ;;  %v236_v18 = vld [vmem:[%s4369_s3 + $0x40] sm:$0xff]  ;;  %v377_v54 = vld [vmem:[%s4369_s3 + $0x48] sm:$0xff]  ;;  %v503_v61 = vld [vmem:[%s4369_s3 + $0xd0] sm:$0xff] }
   0xb   :  { %2639 = vmatprep.subr.mxu1 %v238_v16  ;;  %v235_v19 = vld [vmem:[%s4369_s3] sm:$0xff]  ;;  %v376_v58 = vld [vmem:[%s4369_s3 + $0x8] sm:$0xff]  ;;  %v630_v62 = vld [vmem:[%s4369_s3 + $0x198] sm:$0xff] }
   0xc   :  { %2640 = vmatpush3.msra.mxu1 %v238_v16  ;;  %v2302_v32 = vld [vmem:[%s4372_s1] ss:$0 sm:$0xff]  ;;  %v502_v63 = vld [vmem:[%s4369_s3 + $0x90] sm:$0xff]  ;;  %v629_v1 = vld [vmem:[%s4369_s3 + $0x158] sm:$0xff] }
   0xd   :  { %115 = vperm.xlu0 %3134, %v108_v3   ;;  %121 = vperm.xlu1 %3135, %v110_v4   ;;  %v2303_v34 = vld [vmem:[%s4373_s2] ss:$0 sm:$0xff]  ;;  %v501_v2 = vld [vmem:[%s4369_s3 + $0x50] sm:$0xff]  ;;  %v628_v3 = vld [vmem:[%s4369_s3 + $0x118] sm:$0xff] }
   0xe   :  { %2641 = vmatprep.subr.mxu1 %v237_v17  ;;  %v500_v4 = vld [vmem:[%s4369_s3 + $0x10] sm:$0xff]  ;;  %v627_v5 = vld [vmem:[%s4369_s3 + $0xd8] sm:$0xff]  ;;  %v755_v6 = vld [vmem:[%s4369_s3 + $0x1e0] sm:$0xff] }
   0xf   :  { %2642 = vmatpush3.msra.mxu1 %v237_v17  ;;  %v626_v9 = vld [vmem:[%s4369_s3 + $0x98] sm:$0xff]  ;;  %v751_v16 = vld [vmem:[%s4369_s3 + $0xe0] sm:$0xff]  ;;  %v878_v17 = vld [vmem:[%s4369_s3 + $0x1a8] sm:$0xff] }
  0x10   :  { %2643 = vmatprep.subr.mxu1 %v236_v18  ;;  %v624_v13 = vld [vmem:[%s4369_s3 + $0x18] sm:$0xff] }
  0x11   :  { %62 = vperm.xlu0 %3134, %v55_v10   ;;  %67 = vperm.xlu1 %3135, %v56_v11   ;;  %v754_v10 = vld [vmem:[%s4369_s3 + $0x1a0] sm:$0xff]  ;;  %v625_v11 = vld [vmem:[%s4369_s3 + $0x58] sm:$0xff] }
  0x12   :  { %2644 = vmatpush3.msra.mxu1 %v236_v18  ;;  %v750_v18 = vld [vmem:[%s4369_s3 + $0xa0] sm:$0xff] }
  0x13   :  { %2645 = vmatprep.subr.mxu1 %v235_v19 }
  0x14   :  { %2646 = vmatpush3.msra.mxu1 %v235_v19  ;;  %v877_v19 = vld [vmem:[%s4369_s3 + $0x168] sm:$0xff] }
  0x15   :  { %72 = vperm.xlu0 %3134, %v57_v14   ;;  %77 = vperm.xlu1 %3135, %v58_v15   ;;  %v752_v14 = vld [vmem:[%s4369_s3 + $0x120] sm:$0xff]  ;;  %v879_v15 = vld [vmem:[%s4369_s3 + $0x1e8] sm:$0xff] }
  0x16   :  { %2675 = vmatprep.subr.mxu1 %v3333_v20 }
  0x84   :  { %v113_v23 = vpop.permute.xlu0 %112  ;;  %v119_v24 = vpop.permute.xlu1 %118 }
  0x85   :  { %vm123_vm1 = vcmp.eq.s32.totalorder %v106_v22, %v113_v23  ;;  %vm125_vm2 = vcmp.eq.s32.totalorder %v106_v22, %v119_v24  ;;  %v748_v23 = vld [vmem:[%s4369_s3 + $0x20] sm:$0xff]  ;;  %v875_v24 = vld [vmem:[%s4369_s3 + $0xe8] sm:$0xff] }
  0x86   :  { %v2304_v26 = vsel %vm123_vm1, 1.0, %v4386_v25  ;;  %v2306_v29 = vsel %vm125_vm2, 1.0, %v4386_v25 }
  0x87   :  { %2625 = vmatprep.mubr.msk.f32.mxu0 %vm137_vm0, %v2304_v26  ;;  %v1003_v26 = vld [vmem:[%s4369_s3 + $0x1f0] sm:$0xff] }
  0x88   :  { %v116_v27 = vpop.permute.xlu0 %115  ;;  %v122_v28 = vpop.permute.xlu1 %121 }
  0x89   :  { %vm124_vm3 = vcmp.eq.s32.totalorder %v106_v22, %v116_v27  ;;  %vm126_vm4 = vcmp.eq.s32.totalorder %v106_v22, %v122_v28  ;;  %v876_v22 = vld [vmem:[%s4369_s3 + $0x128] sm:$0xff]  ;;  %v1002_v28 = vld [vmem:[%s4369_s3 + $0x1b0] sm:$0xff] }
  0x8a   :  { %v2305_v30 = vsel %vm124_vm3, 1.0, %v4386_v25  ;;  %v2307_v33 = vsel %vm126_vm4, 1.0, %v4386_v25  ;;  %v874_v27 = vld [vmem:[%s4369_s3 + $0xa8] sm:$0xff] }
  0x8b   :  { %2626 = vmatmul.mubr.msk.f32.vlgmr.msra.gmra.mxu0 %vm137_vm0, %v2305_v30  ;;  %v1001_v30 = vld [vmem:[%s4369_s3 + $0x170] sm:$0xff] }
  0x8c   :  { %2654 = vmatpush3.msra.mxu0 %v383_v12  ;;  %v63_v35 = vpop.permute.xlu0 %62  ;;  %v68_v36 = vpop.permute.xlu1 %67  ;;  %2628 = vmatprep.mubr.msk.f32.mxu0 %vm137_vm0, %v2306_v29  ;;  %v753_v12 = vld [vmem:[%s4369_s3 + $0x160] sm:$0xff]  ;;  %v873_v29 = vld [vmem:[%s4369_s3 + $0x68] sm:$0xff] }
  0x8d   :  { %2655 = vmatprep.subr.mxu0 %v382_v31  ;;  %v86_v38 = vmul.f32 %v2302_v32, %v63_v35  ;;  %v87_v39 = vmul.f32 %v2302_v32, %v68_v36  ;;  %v1126_v35 = vld [vmem:[%s4369_s3 + $0x1b8] sm:$0xff]  ;;  %v998_v36 = vld [vmem:[%s4369_s3 + $0xb0] sm:$0xff] }
  0x8e   :  { %2656 = vmatpush3.msra.mxu0 %v382_v31  ;;  %v872_v31 = vld [vmem:[%s4369_s3 + $0x28] sm:$0xff] }
  0x8f   :  { %v97_v41 = vadd.f32 %v2303_v34, %v86_v38  ;;  %v98_v42 = vadd.f32 %v2303_v34, %v87_v39  ;;  %2657 = vmatprep.subr.mxu0 %v381_v37  ;;  %2629 = vmatmul.mubr.msk.f32.gmra.mxu0 %vm137_vm0, %v2307_v33  ;;  %v1127_v33 = vld [vmem:[%s4369_s3 + $0x1f8] sm:$0xff]  ;;  %v997_v38 = vld [vmem:[%s4369_s3 + $0x70] sm:$0xff] }
  0x90   :  { %2658 = vmatpush3.msra.mxu0 %v381_v37  ;;  %v73_v43 = vpop.permute.xlu0 %72  ;;  %v78_v44 = vpop.permute.xlu1 %77  ;;  %v1125_v37 = vld [vmem:[%s4369_s3 + $0x178] sm:$0xff] }
  0x91   :  { %v3363_v46 = vmax.f32 %v97_v41, 0.0  ;;  %v3365_v47 = vmax.f32 %v98_v42, 0.0  ;;  %2659 = vmatprep.subr.mxu0 %v380_v40  ;;  %v88_v48 = vmul.f32 %v2302_v32, %v73_v43  ;;  %v89_v49 = vmul.f32 %v2302_v32, %v78_v44  ;;  %v1000_v32 = vld [vmem:[%s4369_s3 + $0x130] sm:$0xff]  ;;  %v1124_v39 = vld [vmem:[%s4369_s3 + $0x138] sm:$0xff] }
  0x92   :  { %2660 = vmatpush3.msra.mxu0 %v380_v40  ;;  %v996_v40 = vld [vmem:[%s4369_s3 + $0x30] sm:$0xff]  ;;  %v1123_v41 = vld [vmem:[%s4369_s3 + $0xf8] sm:$0xff] }
  0x93   :  { %v99_v51 = vadd.f32 %v2303_v34, %v88_v48  ;;  %v100_v52 = vadd.f32 %v2303_v34, %v89_v49  ;;  %2661 = vmatprep.subr.mxu0 %v379_v45  ;;  %2647 = vmatprep.mubr.msk.f32.mxu1 %vm250_vm5, %v3363_v46  ;;  %v999_v34 = vld [vmem:[%s4369_s3 + $0xf0] sm:$0xff]  ;;  %v1122_v42 = vld [vmem:[%s4369_s3 + $0xb8] sm:$0xff]  ;;  %v3169_v49 = vmov 1  }
  0x94   :  { %2662 = vmatpush3.msra.mxu0 %v379_v45  ;;  %2669 = vmatprep.mubr.msk.f32.mxu0 %vm250_vm5, %v3363_v46  ;;  %v1121_v43 = vld [vmem:[%s4369_s3 + $0x78] sm:$0xff]  ;;  %v3168_v45 = vmov 3  }
  0x95   :  { %v3380_v55 = vmax.f32 %v99_v51, 0.0  ;;  %2648 = vmatmul.mubr.msk.f32.vlgmr.msra.gmra.mxu1 %vm250_vm5, %v3365_v47  ;;  %2663 = vmatprep.subr.mxu0 %v378_v50  ;;  %v3384_v56 = vmax.f32 %v100_v52, 0.0  ;;  %v1120_v44 = vld [vmem:[%s4369_s3 + $0x38] sm:$0xff]  ;;  %v3172_v52 = vmov 5  }
  0x96   :  { %2676 = vmatpush3.msra.mxu1 %v3333_v20  ;;  %2664 = vmatpush3.msra.mxu0 %v378_v50  ;;  %v749_v20 = vld [vmem:[%s4369_s3 + $0x60] sm:$0xff]  ;;  %v3170_v50 = vmov 2  }
  0x97   :  { %2677 = vmatprep.subr.mxu1 %v506_v53  ;;  %2665 = vmatprep.subr.mxu0 %v377_v54 }
  0x98   :  { %2678 = vmatpush3.msra.mxu1 %v506_v53  ;;  %2650 = vmatprep.mubr.msk.f32.mxu1 %vm250_vm5, %v3380_v55  ;;  %v3173_v53 = vmov 6  }
  0x99   :  { %2666 = vmatpush3.msra.mxu0 %v377_v54  ;;  %2679 = vmatprep.subr.mxu1 %v505_v57  ;;  %v3174_v54 = vmov 7  }
  0x9a   :  { %2651 = vmatmul.mubr.msk.f32.gmra.mxu1 %vm250_vm5, %v3384_v56  ;;  %2667 = vmatprep.subr.mxu0 %v376_v58 }
  0x9b   :  { %2680 = vmatpush3.msra.mxu1 %v505_v57  ;;  %2668 = vmatpush3.msra.mxu0 %v376_v58  ;;  %v3610_v57 = vld [vmem:[%s4375_s6] ss:$0 sm:$0xff] }
  0x9c   :  { %2681 = vmatprep.subr.mxu1 %v504_v59  ;;  %2691 = vmatprep.mubr.msk.f32.mxu1 %vm250_vm5, %v3363_v46  ;;  %4391 = vst [vmem:[#allocation4_spill] sm:$0xff] %v3610_v57 }
  0x9d   :  { %2670 = vmatmul.mubr.msk.f32.vlgmr.msra.gmra.mxu0 %vm250_vm5, %v3365_v47  ;;  %2682 = vmatpush3.msra.mxu1 %v504_v59  ;;  %v1468_v59 = vld [vmem:[%s4376_s10 + $0xe8] sm:$0xff] }
  0x9e   :  { %2697 = vmatprep.subr.mxu0 %v631_v60  ;;  %2672 = vmatprep.mubr.msk.f32.mxu0 %vm250_vm5, %v3380_v55 }
  0x9f   :  { %2683 = vmatprep.subr.mxu1 %v503_v61  ;;  %2698 = vmatpush3.msra.mxu0 %v631_v60 }
  0xa0   :  { %2684 = vmatpush3.msra.mxu1 %v503_v61  ;;  %2699 = vmatprep.subr.mxu0 %v630_v62 }
  0xa1   :  { %2685 = vmatprep.subr.mxu1 %v502_v63  ;;  %2700 = vmatpush3.msra.mxu0 %v630_v62 }
  0xa2   :  { %2673 = vmatmul.mubr.msk.f32.gmra.mxu0 %vm250_vm5, %v3384_v56  ;;  %2686 = vmatpush3.msra.mxu1 %v502_v63 }
  0xa3   :  { %2701 = vmatprep.subr.mxu0 %v629_v1  ;;  %2687 = vmatprep.subr.mxu1 %v501_v2 }
  0xa4   :  { %2702 = vmatpush3.msra.mxu0 %v629_v1  ;;  %2713 = vmatprep.mubr.msk.f32.mxu0 %vm250_vm5, %v3363_v46 }
  0xa5   :  { %2688 = vmatpush3.msra.mxu1 %v501_v2  ;;  %2703 = vmatprep.subr.mxu0 %v628_v3 }
  0xa6   :  { %2689 = vmatprep.subr.mxu1 %v500_v4  ;;  %2704 = vmatpush3.msra.mxu0 %v628_v3 }
  0xa7   :  { %2690 = vmatpush3.msra.mxu1 %v500_v4  ;;  %2705 = vmatprep.subr.mxu0 %v627_v5 }
  0xa8   :  { %2692 = vmatmul.mubr.msk.f32.vlgmr.msra.gmra.mxu1 %vm250_vm5, %v3365_v47  ;;  %2706 = vmatpush3.msra.mxu0 %v627_v5 }
  0xa9   :  { %2719 = vmatprep.subr.mxu1 %v755_v6  ;;  %2694 = vmatprep.mubr.msk.f32.mxu1 %vm250_vm5, %v3380_v55 }
  0xaa   :  { %2707 = vmatprep.subr.mxu0 %v626_v9  ;;  %2720 = vmatpush3.msra.mxu1 %v755_v6 }
  0xab   :  { %2708 = vmatpush3.msra.mxu0 %v626_v9  ;;  %2721 = vmatprep.subr.mxu1 %v754_v10 }
  0xac   :  { %2709 = vmatprep.subr.mxu0 %v625_v11  ;;  %2722 = vmatpush3.msra.mxu1 %v754_v10  ;;  %v1467_v10 = vld [vmem:[%s4376_s10 + $0xe0] sm:$0xff] }
  0xad   :  { %2695 = vmatmul.mubr.msk.f32.gmra.mxu1 %vm250_vm5, %v3384_v56  ;;  %2710 = vmatpush3.msra.mxu0 %v625_v11  ;;  %v1466_v11 = vld [vmem:[%s4376_s10 + $0xd8] sm:$0xff] }
  0xae   :  { %2723 = vmatprep.subr.mxu1 %v753_v12  ;;  %2711 = vmatprep.subr.mxu0 %v624_v13 }
  0xaf   :  { %2724 = vmatpush3.msra.mxu1 %v753_v12  ;;  %2735 = vmatprep.mubr.msk.f32.mxu1 %vm250_vm5, %v3363_v46  ;;  %v1465_v12 = vld [vmem:[%s4376_s10 + $0xd0] sm:$0xff] }
  0xb0   :  { %2712 = vmatpush3.msra.mxu0 %v624_v13  ;;  %2725 = vmatprep.subr.mxu1 %v752_v14 }
  0xb1   :  { %2714 = vmatmul.mubr.msk.f32.vlgmr.msra.gmra.mxu0 %vm250_vm5, %v3365_v47  ;;  %2726 = vmatpush3.msra.mxu1 %v752_v14 }
  0xb2   :  { %2741 = vmatprep.subr.mxu0 %v879_v15  ;;  %2716 = vmatprep.mubr.msk.f32.mxu0 %vm250_vm5, %v3380_v55 }
  0xb3   :  { %2727 = vmatprep.subr.mxu1 %v751_v16  ;;  %2742 = vmatpush3.msra.mxu0 %v879_v15  ;;  %v1464_v15 = vld [vmem:[%s4376_s10 + $0xc8] sm:$0xff] }
  0xb4   :  { %2728 = vmatpush3.msra.mxu1 %v751_v16  ;;  %2743 = vmatprep.subr.mxu0 %v878_v17 }
  0xb5   :  { %2729 = vmatprep.subr.mxu1 %v750_v18  ;;  %2744 = vmatpush3.msra.mxu0 %v878_v17 }
  0xb6   :  { %2717 = vmatmul.mubr.msk.f32.gmra.mxu0 %vm250_vm5, %v3384_v56  ;;  %2730 = vmatpush3.msra.mxu1 %v750_v18  ;;  %v1463_v18 = vld [vmem:[%s4376_s10 + $0xc0] sm:$0xff] }
  0xb7   :  { %2745 = vmatprep.subr.mxu0 %v877_v19  ;;  %2731 = vmatprep.subr.mxu1 %v749_v20 }
  0xb8   :  { %2746 = vmatpush3.msra.mxu0 %v877_v19  ;;  %2757 = vmatprep.mubr.msk.f32.mxu0 %vm250_vm5, %v3363_v46 }
  0xb9   :  { %2732 = vmatpush3.msra.mxu1 %v749_v20  ;;  %2747 = vmatprep.subr.mxu0 %v876_v22 }
  0xba   :  { %2733 = vmatprep.subr.mxu1 %v748_v23  ;;  %2748 = vmatpush3.msra.mxu0 %v876_v22 }
  0xbb   :  { %2734 = vmatpush3.msra.mxu1 %v748_v23  ;;  %2749 = vmatprep.subr.mxu0 %v875_v24 }
  0xbc   :  { %2736 = vmatmul.mubr.msk.f32.vlgmr.msra.gmra.mxu1 %vm250_vm5, %v3365_v47  ;;  %2750 = vmatpush3.msra.mxu0 %v875_v24 }
  0xbd   :  { %2763 = vmatprep.subr.mxu1 %v1003_v26  ;;  %2738 = vmatprep.mubr.msk.f32.mxu1 %vm250_vm5, %v3380_v55 }
  0xbe   :  { %2751 = vmatprep.subr.mxu0 %v874_v27  ;;  %2764 = vmatpush3.msra.mxu1 %v1003_v26 }
  0xbf   :  { %2752 = vmatpush3.msra.mxu0 %v874_v27  ;;  %2765 = vmatprep.subr.mxu1 %v1002_v28 }
  0xc0   :  { %2753 = vmatprep.subr.mxu0 %v873_v29  ;;  %2766 = vmatpush3.msra.mxu1 %v1002_v28 }
  0xc1   :  { %2739 = vmatmul.mubr.msk.f32.gmra.mxu1 %vm250_vm5, %v3384_v56  ;;  %2754 = vmatpush3.msra.mxu0 %v873_v29 }
  0xc2   :  { %2767 = vmatprep.subr.mxu1 %v1001_v30  ;;  %2755 = vmatprep.subr.mxu0 %v872_v31 }
  0xc3   :  { %2768 = vmatpush3.msra.mxu1 %v1001_v30  ;;  %2779 = vmatprep.mubr.msk.f32.mxu1 %vm250_vm5, %v3363_v46 }
  0xc4   :  { %2756 = vmatpush3.msra.mxu0 %v872_v31  ;;  %2769 = vmatprep.subr.mxu1 %v1000_v32 }
  0xc5   :  { %2758 = vmatmul.mubr.msk.f32.vlgmr.msra.gmra.mxu0 %vm250_vm5, %v3365_v47  ;;  %2770 = vmatpush3.msra.mxu1 %v1000_v32 }
  0xc6   :  { %2785 = vmatprep.subr.mxu0 %v1127_v33  ;;  %2760 = vmatprep.mubr.msk.f32.mxu0 %vm250_vm5, %v3380_v55 }
  0xc7   :  { %2771 = vmatprep.subr.mxu1 %v999_v34  ;;  %2786 = vmatpush3.msra.mxu0 %v1127_v33 }
  0xc8   :  { %2772 = vmatpush3.msra.mxu1 %v999_v34  ;;  %2787 = vmatprep.subr.mxu0 %v1126_v35 }
  0xc9   :  { %2773 = vmatprep.subr.mxu1 %v998_v36  ;;  %2788 = vmatpush3.msra.mxu0 %v1126_v35 }
  0xca   :  { %2761 = vmatmul.mubr.msk.f32.gmra.mxu0 %vm250_vm5, %v3384_v56  ;;  %2774 = vmatpush3.msra.mxu1 %v998_v36 }
  0xcb   :  { %2789 = vmatprep.subr.mxu0 %v1125_v37  ;;  %2775 = vmatprep.subr.mxu1 %v997_v38 }
  0xcc   :  { %2790 = vmatpush3.msra.mxu0 %v1125_v37  ;;  %2801 = vmatprep.mubr.msk.f32.mxu0 %vm250_vm5, %v3363_v46 }
  0xcd   :  { %2776 = vmatpush3.msra.mxu1 %v997_v38  ;;  %2791 = vmatprep.subr.mxu0 %v1124_v39 }
  0xce   :  { %2777 = vmatprep.subr.mxu1 %v996_v40  ;;  %2792 = vmatpush3.msra.mxu0 %v1124_v39 }
  0xcf   :  { %2778 = vmatpush3.msra.mxu1 %v996_v40  ;;  %2793 = vmatprep.subr.mxu0 %v1123_v41 }
  0xd0   :  { %2780 = vmatmul.mubr.msk.f32.vlgmr.msra.gmra.mxu1 %vm250_vm5, %v3365_v47  ;;  %2794 = vmatpush3.msra.mxu0 %v1123_v41 }
  0xd1   :  { %2782 = vmatprep.mubr.msk.f32.mxu1 %vm250_vm5, %v3380_v55  ;;  %2795 = vmatprep.subr.mxu0 %v1122_v42 }
  0xd2   :  { %2796 = vmatpush3.msra.mxu0 %v1122_v42  ;;  %3138 = vset.pattern.permute.xlu0 %v3168_v45 }
  0xd3   :  { %2797 = vmatprep.subr.mxu0 %v1121_v43  ;;  %2823 = vmatprep.subr.mxu1 %v4386_v25 }
  0xd4   :  { %2783 = vmatmul.mubr.msk.f32.gmra.mxu1 %vm250_vm5, %v3384_v56  ;;  %2798 = vmatpush3.msra.mxu0 %v1121_v43  ;;  %v3712_v43 = vld [vmem:[%s4377_s4] ss:$0 sm:$0xff] }
  0xd5   :  { %2799 = vmatprep.subr.mxu0 %v1120_v44 }
  0xd6   :  { %2800 = vmatpush3.msra.mxu0 %v1120_v44  ;;  %v2317_v44 = vld [vmem:[%s4377_s4 + $0x1] ss:$0 sm:$0xff] }
  0xd7   :  { %2802 = vmatmul.mubr.msk.f32.vlgmr.msra.gmra.mxu0 %vm250_vm5, %v3365_v47  ;;  %v3171_v47 = vmov 4  }
  0xd8   :  { %2804 = vmatprep.mubr.msk.f32.mxu0 %vm250_vm5, %v3380_v55 }
  0xdb   :  { %2805 = vmatmul.mubr.msk.f32.gmra.mxu0 %vm250_vm5, %v3384_v56  ;;  %v1258_v56 = vld [vmem:[%s4374_s8] sm:$0xff] }
  0xdc   :  { %2809 = vmatprep.mubr.msk.f32.mxu0 %vm1259_vm6, %v3292_v8  ;;  %2807 = vmatprep.subr.mxu0 %v1258_v56 }
  0xdd   :  { %2808 = vmatpush3.msra.mxu0 %v1258_v56 }
  0xdf   :  { %2810 = vmatmul.mubr.msk.f32.vlgmr.msra.gmra.mxu0 %vm1259_vm6, %v3286_v7  ;;  %v1470_v7 = vld [vmem:[%s4376_s10 + $0xf8] sm:$0xff] }
  0xe0   :  { %2824 = vmatpush3.msra.mxu1 %v1470_v7 }
  0xe1   :  { %2825 = vmatprep.subr.mxu1 %v4386_v25 }
 0x14b   :  { %v2627_v46 = vpop.f32.mrf.mxu0 }
 0x14c   :  { %355 = vperm.xlu1 %3135, %v2627_v46   ;;  %729 = vperm.xlu0 %3138, %v2627_v46  }
 0x14d   :  { %v3587_v48 = vpop.f32.mrf.mxu0 }
 0x14f   :  { %v2630_v51 = vpop.f32.mrf.mxu0 }
 0x150   :  { %3136 = vset.pattern.permute.xlu1 %v3169_v49  ;;  %3142 = vset.pattern.permute.xlu0 %v3166_v0 }
 0x151   :  { %481 = vperm.xlu1 %3136, %v2627_v46   ;;  %350 = vperm.xlu0 %3142, %v3587_v48   ;;  %v226_v55 = vpop.f32.mrf.mxu0 }
 0x155   :  { %3137 = vset.pattern.permute.xlu1 %v3170_v50  ;;  %3146 = vset.pattern.permute.xlu0 %v3171_v47  ;;  %v3635_v62 = vpop.f32.mrf.mxu1 }
 0x156   :  { %605 = vperm.xlu1 %3137, %v2627_v46   ;;  %849 = vperm.xlu0 %3146, %v3587_v48  }
 0x157   :  { %v3639_v1 = vpop.f32.mrf.mxu1 }
 0x15a   :  { %3139 = vset.pattern.permute.xlu1 %v3171_v47  ;;  %3148 = vset.pattern.permute.xlu0 %v3166_v0  ;;  %v2652_v4 = vpop.f32.mrf.mxu1 }
 0x15b   :  { %853 = vperm.xlu1 %3139, %v2627_v46   ;;  %365 = vperm.xlu0 %3148, %v2630_v51  }
 0x15c   :  { %v3661_v13 = vpop.f32.mrf.mxu1 }
 0x15d   :  { %v3643_v3 = vpop.f32.mrf.mxu0 }
 0x15f   :  { %3140 = vset.pattern.permute.xlu1 %v3172_v52  ;;  %3150 = vset.pattern.permute.xlu0 %v3170_v50  ;;  %v3647_v6 = vpop.f32.mrf.mxu0 }
 0x160   :  { %977 = vperm.xlu1 %3140, %v2627_v46   ;;  %613 = vperm.xlu0 %3150, %v2630_v51  }
 0x162   :  { %v2674_v14 = vpop.f32.mrf.mxu0 }
 0x164   :  { %3141 = vset.pattern.permute.xlu1 %v3173_v53  ;;  %3153 = vset.pattern.permute.xlu0 %v3172_v52  ;;  %v3677_v20 = vpop.f32.mrf.mxu0 }
 0x165   :  { %1101 = vperm.xlu1 %3141, %v2627_v46   ;;  %985 = vperm.xlu0 %3153, %v2630_v51  }
 0x168   :  { %v3675_v19 = vpop.f32.mrf.mxu1 }
 0x169   :  { %3143 = vset.pattern.permute.xlu1 %v3169_v49  ;;  %3155 = vset.pattern.permute.xlu0 %v3174_v54 }
 0x16a   :  { %477 = vperm.xlu1 %3143, %v3587_v48   ;;  %1233 = vperm.xlu0 %3155, %v2630_v51   ;;  %v3683_v23 = vpop.f32.mrf.mxu1 }
 0x16d   :  { %v2696_v27 = vpop.f32.mrf.mxu1 }
 0x16e   :  { %3144 = vset.pattern.permute.xlu1 %v3170_v50  ;;  %3156 = vset.pattern.permute.xlu0 %v3166_v0 }
 0x16f   :  { %601 = vperm.xlu1 %3144, %v3587_v48   ;;  %360 = vperm.xlu0 %3156, %v226_v55   ;;  %v3691_v31 = vpop.f32.mrf.mxu1 }
 0x171   :  { %v3685_v26 = vpop.f32.mrf.mxu0 }
 0x173   :  { %3145 = vset.pattern.permute.xlu1 %v3168_v45  ;;  %3158 = vset.pattern.permute.xlu0 %v3170_v50  ;;  %v3689_v29 = vpop.f32.mrf.mxu0  ;;  %v2322_v50 = vld [vmem:[%s4377_s4 + $0x2] ss:$0 sm:$0xff] }
 0x174   :  { %725 = vperm.xlu1 %3145, %v3587_v48   ;;  %609 = vperm.xlu0 %3158, %v226_v55   ;;  %v597_v56 = vadd.f32 %v2696_v27, %v2322_v50 }
 0x176   :  { %v2718_v32 = vpop.f32.mrf.mxu0 }
 0x178   :  { %3147 = vset.pattern.permute.xlu1 %v3172_v52  ;;  %3159 = vset.pattern.permute.xlu0 %v3168_v45  ;;  %v3697_v36 = vpop.f32.mrf.mxu0 }
 0x179   :  { %973 = vperm.xlu1 %3147, %v3587_v48   ;;  %733 = vperm.xlu0 %3159, %v226_v55  }
 0x17c   :  { %v3695_v35 = vpop.f32.mrf.mxu1 }
 0x17d   :  { %3149 = vset.pattern.permute.xlu1 %v3169_v49  ;;  %3161 = vset.pattern.permute.xlu0 %v3172_v52 }
 0x17e   :  { %489 = vperm.xlu1 %3149, %v2630_v51   ;;  %981 = vperm.xlu0 %3161, %v226_v55   ;;  %v3703_v39 = vpop.f32.mrf.mxu1 }
 0x182   :  { %3151 = vset.pattern.permute.xlu1 %v3168_v45  ;;  %3163 = vset.pattern.permute.xlu0 %v3174_v54  ;;  %v2740_v45 = vpop.f32.mrf.mxu1 }
 0x183   :  { %737 = vperm.xlu1 %3151, %v2630_v51   ;;  %1229 = vperm.xlu0 %3163, %v226_v55  }
 0x184   :  { %v3721_v52 = vpop.f32.mrf.mxu1 }
 0x185   :  { %v3701_v38 = vpop.f32.mrf.mxu0 }
 0x187   :  { %3152 = vset.pattern.permute.xlu1 %v3171_v47  ;;  %1225 = vperm.xlu0 %3163, %v2627_v46   ;;  %v3705_v41 = vpop.f32.mrf.mxu0  ;;  %v345_v46 = vadd.f32 %v2652_v4, %v3712_v43 }
 0x188   :  { %861 = vperm.xlu1 %3152, %v2630_v51  }
 0x18b   :  { %3165 = vset.pattern.permute.xlu0 %v3166_v0  ;;  %v1245_v0 = vshrl.u32 %v105_v21, 7  ;;  %v1469_v21 = vld [vmem:[%s4376_s10 + $0xf0] sm:$0xff] }
 0x18c   :  { %3154 = vset.pattern.permute.xlu1 %v3173_v53  ;;  %2826 = vmatpush3.msra.mxu1 %v1469_v21 }
 0x18d   :  { %1109 = vperm.xlu1 %3154, %v2630_v51   ;;  %v3612_v8 = vadd.s32 8, %v1245_v0  ;;  %vm1252_vm8 = vcmp.eq.s32.totalorder %v1245_v0, %v3610_v57  ;;  %2827 = vmatprep.subr.mxu1 %v4386_v25 }
 0x18e   :  { %v2353_v58 = vsel %vm1252_vm8, 1.0, %v4386_v25  ;;  %2828 = vmatpush3.msra.mxu1 %v1468_v59 }
 0x18f   :  { %vm1253_vm9 = vcmp.eq.s32.totalorder %v3612_v8, %v3610_v57  ;;  %2820 = vmatprep.mubr.msk.f32.mxu0 %vm1341_vm7, %v2353_v58  ;;  %2829 = vmatprep.subr.mxu1 %v4386_v25  ;;  %v468_v57 = vadd.f32 %v2317_v44, %v3677_v20  ;;  %v1450_v8 = vld [vmem:[%s4376_s10 + $0x68] sm:$0xff] }
 0x190   :  { %2830 = vmatpush3.msra.mxu1 %v1467_v10  ;;  %v3728_v7 = vpop.f32.mrf.mxu1 }
 0x191   :  { %3157 = vset.pattern.permute.xlu1 %v3169_v49  ;;  %2831 = vmatprep.subr.mxu1 %v4386_v25  ;;  %v2762_v49 = vpop.f32.mrf.mxu0 }
 0x192   :  { %485 = vperm.xlu1 %3157, %v226_v55   ;;  %2832 = vmatpush3.msra.mxu1 %v1466_v11  ;;  %v3735_v11 = vld [vmem:[%s4377_s4 + $0x4] ss:$0 sm:$0xff] }
 0x193   :  { %2833 = vmatprep.subr.mxu1 %v4386_v25  ;;  %v3726_v0 = vpop.f32.mrf.mxu0 }
 0x194   :  { %2834 = vmatpush3.msra.mxu1 %v1465_v12 }
 0x195   :  { %2835 = vmatprep.subr.mxu1 %v4386_v25 }
 0x196   :  { %3160 = vset.pattern.permute.xlu1 %v3171_v47  ;;  %2836 = vmatpush3.msra.mxu1 %v1464_v15 }
 0x197   :  { %857 = vperm.xlu1 %3160, %v226_v55   ;;  %2837 = vmatprep.subr.mxu1 %v4386_v25  ;;  %v3730_v59 = vpop.f32.mrf.mxu0 }
 0x198   :  { %2838 = vmatpush3.msra.mxu1 %v1463_v18 }
 0x199   :  { %2839 = vmatprep.subr.mxu1 %v4386_v25  ;;  %v3740_v27 = vpop.f32.mrf.mxu0  ;;  %v335_v25 = vadd.f32 %v3635_v62, %v3712_v43 }
 0x19b   :  { %3162 = vset.pattern.permute.xlu1 %v3173_v53 }
 0x19c   :  { %1105 = vperm.xlu1 %3162, %v226_v55   ;;  %v2327_v55 = vld [vmem:[%s4377_s4 + $0x3] ss:$0 sm:$0xff] }
 0x19d   :  { %v721_v21 = vadd.f32 %v2718_v32, %v2327_v55  ;;  %v3745_v32 = vld [vmem:[%s4377_s4 + $0x5] ss:$0 sm:$0xff]  ;;  %v711_v20 = vadd.f32 %v3685_v26, %v2327_v55  ;;  %v835_v26 = vadd.f32 %v3695_v35, %v3735_v11 }
 0x1a0   :  { %1097 = vperm.xlu1 %3162, %v3587_v48  }
 0x1a4   :  { %3164 = vset.pattern.permute.xlu1 %v3174_v54 }
 0x1a5   :  { %1221 = vperm.xlu1 %3164, %v3587_v48   ;;  %v473_v48 = vadd.f32 %v2674_v14, %v2317_v44  ;;  %v3737_v14 = vpop.f32.mrf.mxu1 }
 0x1c7   :  { %v3631_v60 = vpop.permute.xlu1 %355  ;;  %v3637_v63 = vpop.permute.xlu0 %729 }
 0x1cc   :  { %v3633_v61 = vpop.permute.xlu1 %481  ;;  %v3645_v5 = vpop.permute.xlu0 %350 }
 0x1d1   :  { %v3641_v2 = vpop.permute.xlu1 %605  ;;  %v3667_v16 = vpop.permute.xlu0 %849 }
 0x1d6   :  { %v3649_v9 = vpop.permute.xlu1 %853  ;;  %v366_v24 = vpop.permute.xlu0 %365 }
 0x1d7   :  { %v371_v53 = vmul.f32 %v366_v24, %v345_v46  ;;  %v845_v24 = vadd.f32 %v2740_v45, %v3735_v11  ;;  %v969_v46 = vadd.f32 %v2762_v49, %v3745_v32  ;;  %v2806_v45 = vpop.f32.mrf.mxu0  ;;  %v3758_v49 = vld [vmem:[%s4377_s4 + $0x7] ss:$0 sm:$0xff]  ;;  %v865_v35 = vmul.f32 %v3649_v9, %v835_v26  ;;  %v1461_v26 = vld [vmem:[%s4376_s10 + $0xb0] sm:$0xff] }
 0x1db   :  { %v3669_v17 = vpop.permute.xlu1 %977  ;;  %v614_v30 = vpop.permute.xlu0 %613 }
 0x1dc   :  { %v619_v4 = vmul.f32 %v614_v30, %v597_v56  ;;  %v3751_v56 = vld [vmem:[%s4377_s4 + $0x6] ss:$0 sm:$0xff] }
 0x1e0   :  { %v3680_v22 = vpop.permute.xlu1 %1101  ;;  %v986_v34 = vpop.permute.xlu0 %985 }
 0x1e5   :  { %v3687_v28 = vpop.permute.xlu1 %477  ;;  %v1234_v40 = vpop.permute.xlu0 %1233 }
 0x1ea   :  { %v3693_v33 = vpop.permute.xlu1 %601  ;;  %v361_v47 = vpop.permute.xlu0 %360 }
 0x1ef   :  { %v3699_v37 = vpop.permute.xlu1 %725  ;;  %v610_v12 = vpop.permute.xlu0 %609 }
 0x1f4   :  { %v3707_v42 = vpop.permute.xlu1 %973 }
 0x1f9   :  { %v490_v51 = vpop.permute.xlu1 %489 }
 0x1fa   :  { %v495_v54 = vmul.f32 %v490_v51, %v473_v48  ;;  %v2784_v48 = vpop.f32.mrf.mxu1 }
 0x1fc   :  { %v499_v58 = vadd.f32 %v495_v54, %v371_v53  ;;  %v734_v54 = vpop.permute.xlu0 %733 }
 0x1fe   :  { %v738_v10 = vpop.permute.xlu1 %737  ;;  %v623_v15 = vadd.f32 %v619_v4, %v499_v58  ;;  %v991_v58 = vmul.f32 %v986_v34, %v969_v46  ;;  %v1093_v4 = vadd.f32 %v2784_v48, %v3751_v56  ;;  %v587_v34 = vadd.f32 %v3675_v19, %v2322_v50 }
 0x1ff   :  { %v743_v18 = vmul.f32 %v738_v10, %v721_v21  ;;  %v463_v10 = vadd.f32 %v3643_v3, %v2317_v44  ;;  %v592_v19 = vadd.f32 %v2322_v50, %v3691_v31  ;;  %v706_v31 = vadd.f32 %v2327_v55, %v3689_v29  ;;  %v1087_v29 = vpop.f32.mrf.mxu1 }
 0x201   :  { %v747_v51 = vadd.f32 %v743_v18, %v623_v15  ;;  %v493_v46 = vmul.f32 %v3633_v61, %v463_v10  ;;  %v330_v10 = vadd.f32 %v3712_v43, %v3639_v1 }
 0x203   :  { %v862_v30 = vpop.permute.xlu1 %861  ;;  %v368_v1 = vmul.f32 %v3645_v5, %v330_v10  ;;  %v964_v5 = vadd.f32 %v3745_v32, %v3726_v0  ;;  %v1207_v0 = vadd.f32 %v3730_v59, %v3758_v49  ;;  %v1078_v59 = vadd.f32 %v3751_v56, %v3737_v14 }
 0x204   :  { %v867_v53 = vmul.f32 %v862_v30, %v845_v24  ;;  %v1217_v24 = vadd.f32 %v2806_v45, %v3758_v49  ;;  %v617_v45 = vmul.f32 %v3641_v2, %v587_v34  ;;  %v1088_v34 = vadd.f32 %v3751_v56, %v1087_v29  ;;  %v1458_v29 = vld [vmem:[%s4376_s10 + $0x98] sm:$0xff] }
 0x206   :  { %v871_v21 = vadd.f32 %v867_v53, %v747_v51  ;;  %v1239_v48 = vmul.f32 %v1234_v40, %v1217_v24  ;;  %v982_v51 = vpop.permute.xlu0 %981  ;;  %v340_v53 = vadd.f32 %v3712_v43, %v3661_v13  ;;  %v582_v13 = vadd.f32 %v2322_v50, %v3683_v23 }
 0x208   :  { %v1110_v15 = vpop.permute.xlu1 %1109  ;;  %v995_v18 = vadd.f32 %v991_v58, %v871_v21  ;;  %v369_v58 = vmul.f32 %v3631_v60, %v335_v25  ;;  %v458_v21 = vadd.f32 %v2317_v44, %v3647_v6  ;;  %v370_v61 = vmul.f32 %v361_v47, %v340_v53 }
 0x209   :  { %v1115_v30 = vmul.f32 %v1110_v15, %v1093_v4  ;;  %v716_v60 = vadd.f32 %v2327_v55, %v3697_v36  ;;  %v618_v6 = vmul.f32 %v610_v12, %v592_v19  ;;  %v616_v23 = vmul.f32 %v3693_v33, %v582_v13  ;;  %v1211_v33 = vpop.f32.mrf.mxu0 }
 0x20a   :  { %v497_v15 = vadd.f32 %v493_v46, %v369_v58  ;;  %v492_v25 = vmul.f32 %v3687_v28, %v458_v21  ;;  %v1230_v43 = vpop.permute.xlu0 %1229  ;;  %v741_v28 = vmul.f32 %v3637_v63, %v711_v20  ;;  %v959_v12 = vadd.f32 %v3701_v38, %v3745_v32 }
 0x20b   :  { %v1119_v3 = vadd.f32 %v1115_v30, %v995_v18  ;;  %v742_v36 = vmul.f32 %v734_v54, %v716_v60  ;;  %v1083_v63 = vadd.f32 %v3728_v7, %v3751_v56  ;;  %v990_v46 = vmul.f32 %v982_v51, %v964_v5  ;;  %v1456_v5 = vld [vmem:[%s4376_s10 + $0x88] sm:$0xff] }
 0x20c   :  { %v621_v2 = vadd.f32 %v617_v45, %v497_v15  ;;  %v496_v55 = vadd.f32 %v492_v25, %v368_v1  ;;  %v989_v38 = vmul.f32 %v3669_v17, %v959_v12  ;;  %v954_v17 = vadd.f32 %v3745_v32, %v3705_v41  ;;  %v1445_v1 = vld [vmem:[%s4376_s10 + $0x40] sm:$0xff] }
 0x20d   :  { %v486_v4 = vpop.permute.xlu1 %485  ;;  %v1243_v62 = vadd.f32 %v1239_v48, %v1119_v3  ;;  %v1212_v3 = vadd.f32 %v3758_v49, %v1211_v33  ;;  %v1113_v7 = vmul.f32 %v3680_v22, %v1083_v63  ;;  %v1202_v41 = vadd.f32 %v3758_v49, %v3740_v27  ;;  %v1451_v27 = vld [vmem:[%s4376_s10 + $0x70] sm:$0xff]  ;;  %v1449_v49 = vld [vmem:[%s4376_s10 + $0x60] sm:$0xff]  ;;  %v1438_v33 = vld [vmem:[%s4376_s10 + $0x8] sm:$0xff] }
 0x20e   :  { %v494_v40 = vmul.f32 %v486_v4, %v468_v57  ;;  %v840_v57 = vadd.f32 %v3735_v11, %v3721_v52  ;;  %v740_v52 = vmul.f32 %v3699_v37, %v706_v31  ;;  %v745_v24 = vadd.f32 %v741_v28, %v621_v2  ;;  %v1226_v53 = vpop.permute.xlu0 %1225  ;;  %v1447_v31 = vld [vmem:[%s4376_s10 + $0x50] sm:$0xff]  ;;  %v1441_v12 = vld [vmem:[%s4376_s10 + $0x20] sm:$0xff] }
 0x20f   :  { %2812 = vmatprep.subr.mxu0 %v1243_v62  ;;  %v620_v54 = vadd.f32 %v616_v23, %v496_v55  ;;  %v830_v37 = vadd.f32 %v3735_v11, %v3703_v39  ;;  %v1238_v39 = vmul.f32 %v1230_v43, %v1212_v3  ;;  %v1237_v11 = vmul.f32 %v1226_v53, %v1207_v0  ;;  %v1462_v23 = vld [vmem:[%s4376_s10 + $0xb8] sm:$0xff]  ;;  %v1443_v28 = vld [vmem:[%s4376_s10 + $0x30] sm:$0xff] }
 0x210   :  { %v498_v44 = vadd.f32 %v494_v40, %v370_v61  ;;  %2813 = vmatpush3.msra.mxu0 %v1243_v62  ;;  %v869_v45 = vadd.f32 %v865_v35, %v745_v24  ;;  %v988_v61 = vmul.f32 %v3707_v42, %v954_v17  ;;  %v4392_v56 = vmov 0.0   ;;  %v1444_v43 = vld [vmem:[%s4376_s10 + $0x38] sm:$0xff]  ;;  %2840 = vmatpush3.msra.mxu1 %v1462_v23  ;;  %v1455_v24 = vld [vmem:[%s4376_s10 + $0x80] sm:$0xff]  ;;  %v1626_v17 = vld [vmem:[%s4376_s10 + $0x168] sm:$0xff] }
 0x211   :  { %v744_v9 = vadd.f32 %v740_v52, %v620_v54  ;;  %v864_v51 = vmul.f32 %v3667_v16, %v830_v37  ;;  %v2354_v2 = vsel %vm1253_vm9, 1.0, %v4392_v56  ;;  %2841 = vmatprep.subr.mxu1 %v4392_v56  ;;  %v1440_v55 = vld [vmem:[%s4376_s10 + $0x18] sm:$0xff]  ;;  %v1457_v52 = vld [vmem:[%s4376_s10 + $0x90] sm:$0xff]  ;;  %v1437_v35 = vld [vmem:[%s4376_s10] sm:$0xff]  ;;  %2855 = vmatprep.mubr.msk.f32.mxu1 %vm3175_vm10, %v4392_v56 }
 0x212   :  { %v622_v50 = vadd.f32 %v618_v6, %v498_v44  ;;  %v858_v47 = vpop.permute.xlu1 %857  ;;  %v993_v62 = vadd.f32 %v989_v38, %v869_v45  ;;  %v1452_v6 = vld [vmem:[%s4376_s10 + $0x78] sm:$0xff]  ;;  %2842 = vmatpush3.msra.mxu1 %v1461_v26  ;;  %v1805_v26 = vld [vmem:[%s4376_s10 + $0x270] sm:$0xff] }
 0x213   :  { %v866_v18 = vmul.f32 %v858_v47, %v840_v57  ;;  %v868_v15 = vadd.f32 %v864_v51, %v744_v9  ;;  %v1448_v44 = vld [vmem:[%s4376_s10 + $0x58] sm:$0xff]  ;;  %v1446_v57 = vld [vmem:[%s4376_s10 + $0x48] sm:$0xff]  ;;  %2843 = vmatprep.subr.mxu1 %v4392_v56  ;;  %v1459_v47 = vld [vmem:[%s4376_s10 + $0xa0] sm:$0xff] }
 0x214   :  { %v746_v30 = vadd.f32 %v742_v36, %v622_v50  ;;  %v1117_v10 = vadd.f32 %v1113_v7, %v993_v62  ;;  %v1460_v36 = vld [vmem:[%s4376_s10 + $0xa8] sm:$0xff]  ;;  %v1628_v53 = vld [vmem:[%s4376_s10 + $0x178] sm:$0xff]  ;;  %v1625_v62 = vld [vmem:[%s4376_s10 + $0x160] sm:$0xff] }
 0x215   :  { %v992_v16 = vadd.f32 %v988_v61, %v868_v15  ;;  %v1442_v50 = vld [vmem:[%s4376_s10 + $0x28] sm:$0xff]  ;;  %2844 = vmatpush3.msra.mxu1 %v1460_v36  ;;  %v1712_v15 = vld [vmem:[%s4376_s10 + $0x1d0] sm:$0xff]  ;;  %v1616_v42 = vld [vmem:[%s4376_s10 + $0x118] sm:$0xff] }
 0x216   :  { %v870_v48 = vadd.f32 %v866_v18, %v746_v30  ;;  %v1241_v20 = vadd.f32 %v1237_v11, %v1117_v10  ;;  %2845 = vmatprep.subr.mxu1 %v4392_v56  ;;  %v1439_v18 = vld [vmem:[%s4376_s10 + $0x10] sm:$0xff]  ;;  %v2811_v30 = vpop.f32.mrf.mxu0  ;;  %v1715_v51 = vld [vmem:[%s4376_s10 + $0x1e8] sm:$0xff]  ;;  %v1624_v11 = vld [vmem:[%s4376_s10 + $0x158] sm:$0xff] }
 0x217   :  { %v1106_v58 = vpop.permute.xlu1 %1105  ;;  %2846 = vmatpush3.msra.mxu1 %v1459_v47  ;;  %v1622_v61 = vld [vmem:[%s4376_s10 + $0x148] sm:$0xff]  ;;  %v1621_v10 = vld [vmem:[%s4376_s10 + $0x140] sm:$0xff] }
 0x218   :  { %v994_v21 = vadd.f32 %v990_v46, %v870_v48  ;;  %v1114_v4 = vmul.f32 %v1106_v58, %v1088_v34  ;;  %2847 = vmatprep.subr.mxu1 %v4392_v56  ;;  %v1332_v63 = vpop.f32.mrf.mxu0  ;;  %v2359_v34 = vld [vmem:[%s4378_s9] ss:$0 sm:$0xff]  ;;  %v1717_v58 = vld [vmem:[%s4376_s10 + $0x1f8] sm:$0xff]  ;;  %v1804_v36 = vld [vmem:[%s4376_s10 + $0x268] sm:$0xff] }
 0x219   :  { %2848 = vmatpush3.msra.mxu1 %v1458_v29  ;;  %v1803_v47 = vld [vmem:[%s4376_s10 + $0x260] sm:$0xff]  ;;  %v1802_v29 = vld [vmem:[%s4376_s10 + $0x258] sm:$0xff] }
 0x21a   :  { %v1118_v19 = vadd.f32 %v1114_v4, %v994_v21  ;;  %2849 = vmatprep.subr.mxu1 %v4392_v56  ;;  %v1627_v21 = vld [vmem:[%s4376_s10 + $0x170] sm:$0xff] }
 0x21b   :  { %v1098_v40 = vpop.permute.xlu1 %1097  ;;  %2850 = vmatpush3.msra.mxu1 %v1457_v52  ;;  %v1716_v4 = vld [vmem:[%s4376_s10 + $0x1f0] sm:$0xff] }
 0x21c   :  { %v1242_v22 = vadd.f32 %v1238_v39, %v1118_v19  ;;  %v1112_v13 = vmul.f32 %v1098_v40, %v1078_v59  ;;  %2851 = vmatprep.subr.mxu1 %v4392_v56  ;;  %v1714_v39 = vld [vmem:[%s4376_s10 + $0x1e0] sm:$0xff]  ;;  %v1713_v19 = vld [vmem:[%s4376_s10 + $0x1d8] sm:$0xff]  ;;  %v1623_v59 = vld [vmem:[%s4376_s10 + $0x150] sm:$0xff] }
 0x21d   :  { %2852 = vmatpush3.msra.mxu1 %v1456_v5  ;;  %v1711_v40 = vld [vmem:[%s4376_s10 + $0x1c8] sm:$0xff]  ;;  %v1801_v52 = vld [vmem:[%s4376_s10 + $0x250] sm:$0xff] }
 0x21e   :  { %2814 = vmatprep.subr.mxu0 %v1242_v22  ;;  %v1116_v25 = vadd.f32 %v1112_v13, %v992_v16  ;;  %2853 = vmatprep.subr.mxu1 %v4392_v56  ;;  %v1620_v13 = vld [vmem:[%s4376_s10 + $0x138] sm:$0xff]  ;;  %v1708_v16 = vld [vmem:[%s4376_s10 + $0x1b0] sm:$0xff]  ;;  %v1800_v5 = vld [vmem:[%s4376_s10 + $0x248] sm:$0xff] }
 0x21f   :  { %2815 = vmatpush3.msra.mxu0 %v1242_v22  ;;  %2854 = vmatpush3.msra.mxu1 %v1455_v24  ;;  %v1710_v22 = vld [vmem:[%s4376_s10 + $0x1c0] sm:$0xff] }
 0x220   :  { %v1222_v32 = vpop.permute.xlu1 %1221  ;;  %2816 = vmatprep.subr.mxu0 %v1241_v20  ;;  %2893 = vmatprep.subr.mxu1 %v4392_v56  ;;  %v1799_v24 = vld [vmem:[%s4376_s10 + $0x240] sm:$0xff] }
 0x221   :  { %v1236_v60 = vmul.f32 %v1222_v32, %v1202_v41  ;;  %2817 = vmatpush3.msra.mxu0 %v1241_v20  ;;  %v1709_v20 = vld [vmem:[%s4376_s10 + $0x1b8] sm:$0xff]  ;;  %v1619_v41 = vld [vmem:[%s4376_s10 + $0x130] sm:$0xff]  ;;  %v1618_v32 = vld [vmem:[%s4376_s10 + $0x128] sm:$0xff] }
 0x223   :  { %v1240_v14 = vadd.f32 %v1236_v60, %v1116_v25  ;;  %v1707_v25 = vld [vmem:[%s4376_s10 + $0x1a8] sm:$0xff]  ;;  %v1617_v60 = vld [vmem:[%s4376_s10 + $0x120] sm:$0xff] }
 0x225   :  { %2818 = vmatprep.subr.mxu0 %v1240_v14 }
 0x226   :  { %2819 = vmatpush3.msra.mxu0 %v1240_v14  ;;  %v1706_v14 = vld [vmem:[%s4376_s10 + $0x1a0] sm:$0xff] }
 0x227   :  { %2821 = vmatmul.mubr.msk.f32.vlgmr.msra.gmra.mxu0 %vm1341_vm7, %v2354_v2  ;;  %2858 = vmatprep.subr.mxu0 %v4392_v56  ;;  %v1705_v2 = vld [vmem:[%s4376_s10 + $0x198] sm:$0xff] }
 0x228   :  { %2859 = vmatpush3.msra.mxu0 %v1452_v6  ;;  %2890 = vmatprep.mubr.msk.f32.mxu0 %vm3175_vm10, %v4392_v56  ;;  %v1615_v6 = vld [vmem:[%s4376_s10 + $0x110] sm:$0xff] }
 0x229   :  { %2860 = vmatprep.subr.mxu0 %v4392_v56 }
 0x22a   :  { %2861 = vmatpush3.msra.mxu0 %v1451_v27  ;;  %v1704_v27 = vld [vmem:[%s4376_s10 + $0x190] sm:$0xff] }
 0x22b   :  { %2862 = vmatprep.subr.mxu0 %v4392_v56 }
 0x22c   :  { %2863 = vmatpush3.msra.mxu0 %v1450_v8  ;;  %v1614_v8 = vld [vmem:[%s4376_s10 + $0x108] sm:$0xff] }
 0x22d   :  { %2864 = vmatprep.subr.mxu0 %v4392_v56 }
 0x22e   :  { %2865 = vmatpush3.msra.mxu0 %v1449_v49  ;;  %v1703_v49 = vld [vmem:[%s4376_s10 + $0x188] sm:$0xff] }
 0x22f   :  { %2866 = vmatprep.subr.mxu0 %v4392_v56 }
 0x230   :  { %2867 = vmatpush3.msra.mxu0 %v1448_v44  ;;  %v1613_v44 = vld [vmem:[%s4376_s10 + $0x100] sm:$0xff] }
 0x231   :  { %2868 = vmatprep.subr.mxu0 %v4392_v56 }
 0x232   :  { %2869 = vmatpush3.msra.mxu0 %v1447_v31  ;;  %v1702_v31 = vld [vmem:[%s4376_s10 + $0x180] sm:$0xff] }
 0x233   :  { %2870 = vmatprep.subr.mxu0 %v4392_v56 }
 0x234   :  { %2871 = vmatpush3.msra.mxu0 %v1446_v57  ;;  %v1806_v57 = vld [vmem:[%s4376_s10 + $0x278] sm:$0xff] }
 0x235   :  { %2872 = vmatprep.subr.mxu0 %v4392_v56 }
 0x236   :  { %2873 = vmatpush3.msra.mxu0 %v1445_v1  ;;  %v1895_v1 = vld [vmem:[%s4376_s10 + $0x2f8] sm:$0xff] }
 0x237   :  { %2874 = vmatprep.subr.mxu0 %v4392_v56 }
 0x238   :  { %2875 = vmatpush3.msra.mxu0 %v1444_v43 }
 0x239   :  { %2876 = vmatprep.subr.mxu0 %v4392_v56 }
 0x23a   :  { %2877 = vmatpush3.msra.mxu0 %v1443_v28  ;;  %v1894_v28 = vld [vmem:[%s4376_s10 + $0x2f0] sm:$0xff] }
 0x23b   :  { %2878 = vmatprep.subr.mxu0 %v4392_v56 }
 0x23c   :  { %2879 = vmatpush3.msra.mxu0 %v1442_v50  ;;  %v1893_v50 = vld [vmem:[%s4376_s10 + $0x2e8] sm:$0xff] }
 0x23d   :  { %2880 = vmatprep.subr.mxu0 %v4392_v56 }
 0x23e   :  { %2881 = vmatpush3.msra.mxu0 %v1441_v12  ;;  %v1892_v12 = vld [vmem:[%s4376_s10 + $0x2e0] sm:$0xff] }
 0x23f   :  { %2882 = vmatprep.subr.mxu0 %v4392_v56 }
 0x240   :  { %2883 = vmatpush3.msra.mxu0 %v1440_v55  ;;  %v1891_v55 = vld [vmem:[%s4376_s10 + $0x2d8] sm:$0xff] }
 0x241   :  { %2884 = vmatprep.subr.mxu0 %v4392_v56 }
 0x242   :  { %2885 = vmatpush3.msra.mxu0 %v1439_v18  ;;  %v1890_v18 = vld [vmem:[%s4376_s10 + $0x2d0] sm:$0xff] }
 0x243   :  { %2886 = vmatprep.subr.mxu0 %v4392_v56 }
 0x244   :  { %2887 = vmatpush3.msra.mxu0 %v1438_v33  ;;  %v1889_v33 = vld [vmem:[%s4376_s10 + $0x2c8] sm:$0xff] }
 0x245   :  { %2888 = vmatprep.subr.mxu0 %v4392_v56 }
 0x246   :  { %2889 = vmatpush3.msra.mxu0 %v1437_v35  ;;  %v1888_v35 = vld [vmem:[%s4376_s10 + $0x2c0] sm:$0xff] }
 0x247   :  { %2928 = vmatprep.subr.mxu0 %v4392_v56 }
 0x2e7   :  { %v2822_v54 = vpop.f32.mrf.mxu0 }
 0x2e8   :  { %v1420_v38 = vadd.f32 %v2822_v54, %v2811_v30  ;;  %v1798_v30 = vld [vmem:[%s4376_s10 + $0x238] sm:$0xff]  ;;  %v1797_v54 = vld [vmem:[%s4376_s10 + $0x230] sm:$0xff] }
 0x2e9   :  { %v1414_v46 = vpop.f32.mrf.mxu0 }
 0x2ea   :  { %v1431_v48 = vadd.f32 %v2359_v34, %v1420_v38  ;;  %v1415_v37 = vadd.f32 %v1414_v46, %v1332_v63  ;;  %v1887_v63 = vld [vmem:[%s4376_s10 + $0x2b8] sm:$0xff]  ;;  %v1796_v38 = vld [vmem:[%s4376_s10 + $0x228] sm:$0xff] }
 0x2eb   :  { %v1885_v46 = vld [vmem:[%s4376_s10 + $0x2a8] sm:$0xff] }
 0x2ec   :  { %v1433_v0 = vmax.f32 %v1431_v48, 0.0  ;;  %v1430_v3 = vadd.f32 %v2359_v34, %v1415_v37  ;;  %v1886_v34 = vld [vmem:[%s4376_s10 + $0x2b0] sm:$0xff]  ;;  %v1795_v48 = vld [vmem:[%s4376_s10 + $0x220] sm:$0xff] }
 0x2ed   :  { %v1884_v37 = vld [vmem:[%s4376_s10 + $0x2a0] sm:$0xff] }
 0x2ee   :  { %1435 = vst [vmem:[#allocation2 + $0x8] sm:$0xff] %v1433_v0  ;;  %v1432_v9 = vmax.f32 %v1430_v3, 0.0  ;;  %v1794_v0 = vld [vmem:[%s4376_s10 + $0x218] sm:$0xff] }
 0x2ef   :  { %v1883_v3 = vld [vmem:[%s4376_s10 + $0x298] sm:$0xff] }
 0x2f0   :  { %1434 = vst [vmem:[#allocation2] sm:$0xff] %v1432_v9  ;;  %v1793_v9 = vld [vmem:[%s4376_s10 + $0x210] sm:$0xff] }
 0x2f7   :  { %v1454_v45 = vld [vmem:[#allocation2 + $0x1] ss:$8 sm:$0x3]  ;;  %v1436_v7 = vld [vmem:[#allocation2] ss:$8 sm:$0x3] }
 0x2f8   :  { %2856 = vmatmul.mubr.f32.vlgmr.msra.gmra.mxu1 %v1454_v45  ;;  %2891 = vmatmul.mubr.f32.vlgmr.msra.gmra.mxu0 %v1436_v7  ;;  %v1612_v23 = vld [vmem:[#allocation2 + $0x2] ss:$8 sm:$0x3]  ;;  %v1701_v43 = vld [vmem:[#allocation2 + $0x3] ss:$8 sm:$0x3] }
 0x2f9   :  { %2894 = vmatpush3.msra.mxu1 %v1628_v53  ;;  %2929 = vmatpush3.msra.mxu0 %v1717_v58  ;;  %v1882_v53 = vld [vmem:[%s4376_s10 + $0x290] sm:$0xff]  ;;  %v1792_v58 = vld [vmem:[%s4376_s10 + $0x208] sm:$0xff]  ;;  %v1791_v7 = vld [vmem:[%s4376_s10 + $0x200] sm:$0xff] }
 0x2fa   :  { %2895 = vmatprep.subr.mxu1 %v4392_v56  ;;  %2930 = vmatprep.subr.mxu0 %v4392_v56  ;;  %v1881_v45 = vld [vmem:[%s4376_s10 + $0x288] sm:$0xff] }
 0x2fb   :  { %2896 = vmatpush3.msra.mxu1 %v1627_v21  ;;  %2931 = vmatpush3.msra.mxu0 %v1716_v4  ;;  %v1880_v21 = vld [vmem:[%s4376_s10 + $0x280] sm:$0xff]  ;;  %v1984_v4 = vld [vmem:[%s4376_s10 + $0x378] sm:$0xff] }
 0x2fc   :  { %2897 = vmatprep.subr.mxu1 %v4392_v56  ;;  %2932 = vmatprep.subr.mxu0 %v4392_v56 }
 0x2fd   :  { %2898 = vmatpush3.msra.mxu1 %v1626_v17  ;;  %2933 = vmatpush3.msra.mxu0 %v1715_v51  ;;  %v2073_v17 = vld [vmem:[%s4376_s10 + $0x3f8] sm:$0xff]  ;;  %v1790_v51 = vld [vmem:[#allocation2 + $0x4] ss:$8 sm:$0x3] }
 0x2fe   :  { %2899 = vmatprep.subr.mxu1 %v4392_v56  ;;  %2934 = vmatprep.subr.mxu0 %v4392_v56 }
 0x2ff   :  { %2900 = vmatpush3.msra.mxu1 %v1625_v62  ;;  %2935 = vmatpush3.msra.mxu0 %v1714_v39  ;;  %v1879_v62 = vld [vmem:[#allocation2 + $0x5] ss:$8 sm:$0x3]  ;;  %v1983_v39 = vld [vmem:[%s4376_s10 + $0x370] sm:$0xff] }
 0x300   :  { %2901 = vmatprep.subr.mxu1 %v4392_v56  ;;  %2936 = vmatprep.subr.mxu0 %v4392_v56 }
 0x301   :  { %2902 = vmatpush3.msra.mxu1 %v1624_v11  ;;  %2937 = vmatpush3.msra.mxu0 %v1713_v19  ;;  %v2072_v11 = vld [vmem:[%s4376_s10 + $0x3f0] sm:$0xff]  ;;  %v1982_v19 = vld [vmem:[%s4376_s10 + $0x368] sm:$0xff] }
 0x302   :  { %2903 = vmatprep.subr.mxu1 %v4392_v56  ;;  %2938 = vmatprep.subr.mxu0 %v4392_v56 }
 0x303   :  { %2904 = vmatpush3.msra.mxu1 %v1623_v59  ;;  %2939 = vmatpush3.msra.mxu0 %v1712_v15  ;;  %v2071_v59 = vld [vmem:[%s4376_s10 + $0x3e8] sm:$0xff]  ;;  %v1981_v15 = vld [vmem:[%s4376_s10 + $0x360] sm:$0xff] }
 0x304   :  { %2905 = vmatprep.subr.mxu1 %v4392_v56  ;;  %2940 = vmatprep.subr.mxu0 %v4392_v56 }
 0x305   :  { %2906 = vmatpush3.msra.mxu1 %v1622_v61  ;;  %2941 = vmatpush3.msra.mxu0 %v1711_v40  ;;  %v2070_v61 = vld [vmem:[%s4376_s10 + $0x3e0] sm:$0xff]  ;;  %v1980_v40 = vld [vmem:[%s4376_s10 + $0x358] sm:$0xff] }
 0x306   :  { %2907 = vmatprep.subr.mxu1 %v4392_v56  ;;  %2942 = vmatprep.subr.mxu0 %v4392_v56 }
 0x307   :  { %2908 = vmatpush3.msra.mxu1 %v1621_v10  ;;  %2943 = vmatpush3.msra.mxu0 %v1710_v22  ;;  %v2069_v10 = vld [vmem:[%s4376_s10 + $0x3d8] sm:$0xff]  ;;  %v1979_v22 = vld [vmem:[%s4376_s10 + $0x350] sm:$0xff] }
 0x308   :  { %2909 = vmatprep.subr.mxu1 %v4392_v56  ;;  %2944 = vmatprep.subr.mxu0 %v4392_v56 }
 0x309   :  { %2910 = vmatpush3.msra.mxu1 %v1620_v13  ;;  %2945 = vmatpush3.msra.mxu0 %v1709_v20  ;;  %v2068_v13 = vld [vmem:[%s4376_s10 + $0x3d0] sm:$0xff]  ;;  %v1978_v20 = vld [vmem:[%s4376_s10 + $0x348] sm:$0xff] }
 0x30a   :  { %2911 = vmatprep.subr.mxu1 %v4392_v56  ;;  %2946 = vmatprep.subr.mxu0 %v4392_v56 }
 0x30b   :  { %2912 = vmatpush3.msra.mxu1 %v1619_v41  ;;  %2947 = vmatpush3.msra.mxu0 %v1708_v16  ;;  %v2067_v41 = vld [vmem:[%s4376_s10 + $0x3c8] sm:$0xff]  ;;  %v1977_v16 = vld [vmem:[%s4376_s10 + $0x340] sm:$0xff] }
 0x30c   :  { %2913 = vmatprep.subr.mxu1 %v4392_v56  ;;  %2948 = vmatprep.subr.mxu0 %v4392_v56 }
 0x30d   :  { %2914 = vmatpush3.msra.mxu1 %v1618_v32  ;;  %2949 = vmatpush3.msra.mxu0 %v1707_v25  ;;  %v2066_v32 = vld [vmem:[%s4376_s10 + $0x3c0] sm:$0xff]  ;;  %v1976_v25 = vld [vmem:[%s4376_s10 + $0x338] sm:$0xff] }
 0x30e   :  { %2915 = vmatprep.subr.mxu1 %v4392_v56  ;;  %2950 = vmatprep.subr.mxu0 %v4392_v56 }
 0x30f   :  { %2916 = vmatpush3.msra.mxu1 %v1617_v60  ;;  %2951 = vmatpush3.msra.mxu0 %v1706_v14  ;;  %v2065_v60 = vld [vmem:[%s4376_s10 + $0x3b8] sm:$0xff]  ;;  %v1975_v14 = vld [vmem:[%s4376_s10 + $0x330] sm:$0xff] }
 0x310   :  { %2917 = vmatprep.subr.mxu1 %v4392_v56  ;;  %2952 = vmatprep.subr.mxu0 %v4392_v56 }
 0x311   :  { %2918 = vmatpush3.msra.mxu1 %v1616_v42  ;;  %2953 = vmatpush3.msra.mxu0 %v1705_v2  ;;  %v2064_v42 = vld [vmem:[%s4376_s10 + $0x3b0] sm:$0xff]  ;;  %v1974_v2 = vld [vmem:[%s4376_s10 + $0x328] sm:$0xff] }
 0x312   :  { %2919 = vmatprep.subr.mxu1 %v4392_v56  ;;  %2954 = vmatprep.subr.mxu0 %v4392_v56 }
 0x313   :  { %2920 = vmatpush3.msra.mxu1 %v1615_v6  ;;  %2955 = vmatpush3.msra.mxu0 %v1704_v27  ;;  %v2063_v6 = vld [vmem:[%s4376_s10 + $0x3a8] sm:$0xff]  ;;  %v1973_v27 = vld [vmem:[%s4376_s10 + $0x320] sm:$0xff] }
 0x314   :  { %2921 = vmatprep.subr.mxu1 %v4392_v56  ;;  %2956 = vmatprep.subr.mxu0 %v4392_v56 }
 0x315   :  { %2922 = vmatpush3.msra.mxu1 %v1614_v8  ;;  %2957 = vmatpush3.msra.mxu0 %v1703_v49  ;;  %v2062_v8 = vld [vmem:[%s4376_s10 + $0x3a0] sm:$0xff]  ;;  %v1972_v49 = vld [vmem:[%s4376_s10 + $0x318] sm:$0xff] }
 0x316   :  { %2923 = vmatprep.subr.mxu1 %v4392_v56  ;;  %2958 = vmatprep.subr.mxu0 %v4392_v56 }
 0x317   :  { %2924 = vmatpush3.msra.mxu1 %v1613_v44  ;;  %2925 = vmatprep.mubr.msk.f32.mxu1 %vm3175_vm10, %v4392_v56  ;;  %v2061_v44 = vld [vmem:[%s4376_s10 + $0x398] sm:$0xff] }
 0x318   :  { %2959 = vmatpush3.msra.mxu0 %v1702_v31  ;;  %2960 = vmatprep.mubr.msk.f32.mxu0 %vm3175_vm10, %v4392_v56  ;;  %v1971_v31 = vld [vmem:[%s4376_s10 + $0x310] sm:$0xff] }
 0x319   :  { %2926 = vmatmul.mubr.f32.vlgmr.msra.gmra.mxu1 %v1612_v23  ;;  %2961 = vmatmul.mubr.f32.vlgmr.msra.gmra.mxu0 %v1701_v43  ;;  %v2059_v23 = vld [vmem:[%s4376_s10 + $0x388] sm:$0xff]  ;;  %v1969_v43 = vld [vmem:[%s4376_s10 + $0x300] sm:$0xff] }
 0x31a   :  { %2963 = vmatprep.subr.mxu1 %v4392_v56  ;;  %2998 = vmatprep.subr.mxu0 %v4392_v56 }
 0x31b   :  { %2964 = vmatpush3.msra.mxu1 %v1806_v57  ;;  %2999 = vmatpush3.msra.mxu0 %v1895_v1  ;;  %v2060_v57 = vld [vmem:[%s4376_s10 + $0x390] sm:$0xff]  ;;  %v1970_v1 = vld [vmem:[%s4376_s10 + $0x308] sm:$0xff] }
 0x31c   :  { %2965 = vmatprep.subr.mxu1 %v4392_v56  ;;  %3000 = vmatprep.subr.mxu0 %v4392_v56 }
 0x31d   :  { %2966 = vmatpush3.msra.mxu1 %v1805_v26  ;;  %3001 = vmatpush3.msra.mxu0 %v1894_v28  ;;  %v2058_v26 = vld [vmem:[%s4376_s10 + $0x380] sm:$0xff] }
 0x31e   :  { %2967 = vmatprep.subr.mxu1 %v4392_v56  ;;  %3002 = vmatprep.subr.mxu0 %v4392_v56  ;;  %v1968_v28 = vld [vmem:[#allocation2 + $0x6] ss:$8 sm:$0x3] }
 0x31f   :  { %2968 = vmatpush3.msra.mxu1 %v1804_v36  ;;  %3003 = vmatpush3.msra.mxu0 %v1893_v50  ;;  %v2057_v36 = vld [vmem:[#allocation2 + $0x7] ss:$8 sm:$0x3]  ;;  %v2161_v50 = vld [vmem:[%s4379_s12 + $0x38] sm:$0xff] }
 0x320   :  { %2969 = vmatprep.subr.mxu1 %v4392_v56  ;;  %3004 = vmatprep.subr.mxu0 %v4392_v56 }
 0x321   :  { %2970 = vmatpush3.msra.mxu1 %v1803_v47  ;;  %3005 = vmatpush3.msra.mxu0 %v1892_v12  ;;  %v2160_v47 = vld [vmem:[%s4379_s12 + $0x30] sm:$0xff]  ;;  %v2159_v12 = vld [vmem:[%s4379_s12 + $0x28] sm:$0xff] }
 0x322   :  { %2971 = vmatprep.subr.mxu1 %v4392_v56  ;;  %3006 = vmatprep.subr.mxu0 %v4392_v56 }
 0x323   :  { %2972 = vmatpush3.msra.mxu1 %v1802_v29  ;;  %3007 = vmatpush3.msra.mxu0 %v1891_v55  ;;  %v2158_v29 = vld [vmem:[%s4379_s12 + $0x20] sm:$0xff]  ;;  %v2157_v55 = vld [vmem:[%s4379_s12 + $0x18] sm:$0xff] }
 0x324   :  { %2973 = vmatprep.subr.mxu1 %v4392_v56  ;;  %3008 = vmatprep.subr.mxu0 %v4392_v56 }
 0x325   :  { %2974 = vmatpush3.msra.mxu1 %v1801_v52  ;;  %3009 = vmatpush3.msra.mxu0 %v1890_v18  ;;  %v2156_v52 = vld [vmem:[%s4379_s12 + $0x10] sm:$0xff]  ;;  %v2155_v18 = vld [vmem:[%s4379_s12 + $0x8] sm:$0xff] }
 0x326   :  { %2975 = vmatprep.subr.mxu1 %v4392_v56  ;;  %3010 = vmatprep.subr.mxu0 %v4392_v56 }
 0x327   :  { %2976 = vmatpush3.msra.mxu1 %v1800_v5  ;;  %3011 = vmatpush3.msra.mxu0 %v1889_v33  ;;  %v2154_v5 = vld [vmem:[%s4379_s12] sm:$0xff] }
 0x328   :  { %2977 = vmatprep.subr.mxu1 %v4392_v56  ;;  %3012 = vmatprep.subr.mxu0 %v4392_v56 }
 0x329   :  { %2978 = vmatpush3.msra.mxu1 %v1799_v24  ;;  %3013 = vmatpush3.msra.mxu0 %v1888_v35 }
 0x32a   :  { %2979 = vmatprep.subr.mxu1 %v4392_v56  ;;  %3014 = vmatprep.subr.mxu0 %v4392_v56 }
 0x32b   :  { %2980 = vmatpush3.msra.mxu1 %v1798_v30  ;;  %3015 = vmatpush3.msra.mxu0 %v1887_v63 }
 0x32c   :  { %2981 = vmatprep.subr.mxu1 %v4392_v56  ;;  %3016 = vmatprep.subr.mxu0 %v4392_v56 }
 0x32d   :  { %2982 = vmatpush3.msra.mxu1 %v1797_v54  ;;  %3017 = vmatpush3.msra.mxu0 %v1886_v34 }
 0x32e   :  { %2983 = vmatprep.subr.mxu1 %v4392_v56  ;;  %3018 = vmatprep.subr.mxu0 %v4392_v56 }
 0x32f   :  { %2984 = vmatpush3.msra.mxu1 %v1796_v38  ;;  %3019 = vmatpush3.msra.mxu0 %v1885_v46 }
 0x330   :  { %2985 = vmatprep.subr.mxu1 %v4392_v56  ;;  %3020 = vmatprep.subr.mxu0 %v4392_v56 }
 0x331   :  { %2986 = vmatpush3.msra.mxu1 %v1795_v48  ;;  %3021 = vmatpush3.msra.mxu0 %v1884_v37 }
 0x332   :  { %2987 = vmatprep.subr.mxu1 %v4392_v56  ;;  %3022 = vmatprep.subr.mxu0 %v4392_v56 }
 0x333   :  { %2988 = vmatpush3.msra.mxu1 %v1794_v0  ;;  %3023 = vmatpush3.msra.mxu0 %v1883_v3 }
 0x334   :  { %2989 = vmatprep.subr.mxu1 %v4392_v56  ;;  %3024 = vmatprep.subr.mxu0 %v4392_v56 }
 0x335   :  { %2990 = vmatpush3.msra.mxu1 %v1793_v9  ;;  %3025 = vmatpush3.msra.mxu0 %v1882_v53 }
 0x336   :  { %2991 = vmatprep.subr.mxu1 %v4392_v56  ;;  %3026 = vmatprep.subr.mxu0 %v4392_v56 }
 0x337   :  { %2992 = vmatpush3.msra.mxu1 %v1792_v58  ;;  %3027 = vmatpush3.msra.mxu0 %v1881_v45 }
 0x338   :  { %2993 = vmatprep.subr.mxu1 %v4392_v56  ;;  %3028 = vmatprep.subr.mxu0 %v4392_v56 }
 0x339   :  { %2994 = vmatpush3.msra.mxu1 %v1791_v7  ;;  %2995 = vmatprep.mubr.msk.f32.mxu1 %vm3175_vm10, %v4392_v56 }
 0x33a   :  { %3029 = vmatpush3.msra.mxu0 %v1880_v21  ;;  %3030 = vmatprep.mubr.msk.f32.mxu0 %vm3175_vm10, %v4392_v56 }
 0x33b   :  { %2996 = vmatmul.mubr.f32.vlgmr.msra.gmra.mxu1 %v1790_v51  ;;  %3031 = vmatmul.mubr.f32.vlgmr.msra.gmra.mxu0 %v1879_v62 }
 0x33c   :  { %3033 = vmatprep.subr.mxu1 %v4392_v56  ;;  %3068 = vmatprep.subr.mxu0 %v4392_v56 }
 0x33d   :  { %3034 = vmatpush3.msra.mxu1 %v1984_v4  ;;  %3069 = vmatpush3.msra.mxu0 %v2073_v17  ;;  %v2360_v4 = vld [vmem:[%s4380_s11] ss:$0 sm:$0xff] }
 0x33e   :  { %3035 = vmatprep.subr.mxu1 %v4392_v56  ;;  %3070 = vmatprep.subr.mxu0 %v4392_v56 }
 0x33f   :  { %3036 = vmatpush3.msra.mxu1 %v1983_v39  ;;  %3071 = vmatpush3.msra.mxu0 %v2072_v11 }
 0x340   :  { %3037 = vmatprep.subr.mxu1 %v4392_v56  ;;  %3072 = vmatprep.subr.mxu0 %v4392_v56 }
 0x341   :  { %3038 = vmatpush3.msra.mxu1 %v1982_v19  ;;  %3073 = vmatpush3.msra.mxu0 %v2071_v59 }
 0x342   :  { %3039 = vmatprep.subr.mxu1 %v4392_v56  ;;  %3074 = vmatprep.subr.mxu0 %v4392_v56 }
 0x343   :  { %3040 = vmatpush3.msra.mxu1 %v1981_v15  ;;  %3075 = vmatpush3.msra.mxu0 %v2070_v61  ;;  %v21_v15 = vstv %s4381_s15  ;;  %v2361_v61 = vld [vmem:[%s4382_s13] ss:$0 sm:$0xff] }
 0x344   :  { %3041 = vmatprep.subr.mxu1 %v4392_v56  ;;  %3076 = vmatprep.subr.mxu0 %v4392_v56  ;;  %22 = vst [vmem:[#allocation3] sm:$0x1] %v21_v15 }
 0x345   :  { %3042 = vmatpush3.msra.mxu1 %v1980_v40  ;;  %3077 = vmatpush3.msra.mxu0 %v2069_v10 }
 0x346   :  { %3043 = vmatprep.subr.mxu1 %v4392_v56  ;;  %3078 = vmatprep.subr.mxu0 %v4392_v56 }
 0x347   :  { %3044 = vmatpush3.msra.mxu1 %v1979_v22  ;;  %3079 = vmatpush3.msra.mxu0 %v2068_v13  ;;  %v2363_v13 = vld [vmem:[%s4383_s14] ss:$0 sm:$0xff] }
 0x348   :  { %3045 = vmatprep.subr.mxu1 %v4392_v56  ;;  %3080 = vmatprep.subr.mxu0 %v4392_v56 }
 0x349   :  { %3046 = vmatpush3.msra.mxu1 %v1978_v20  ;;  %3081 = vmatpush3.msra.mxu0 %v2067_v41 }
 0x34a   :  { %3047 = vmatprep.subr.mxu1 %v4392_v56  ;;  %3082 = vmatprep.subr.mxu0 %v4392_v56 }
 0x34b   :  { %3048 = vmatpush3.msra.mxu1 %v1977_v16  ;;  %3083 = vmatpush3.msra.mxu0 %v2066_v32 }
 0x34c   :  { %3049 = vmatprep.subr.mxu1 %v4392_v56  ;;  %3084 = vmatprep.subr.mxu0 %v4392_v56 }
 0x34d   :  { %3050 = vmatpush3.msra.mxu1 %v1976_v25  ;;  %3085 = vmatpush3.msra.mxu0 %v2065_v60  ;;  %v2364_v60 = vld [vmem:[#allocation3] ss:$0 sm:$0xff] }
 0x34e   :  { %3051 = vmatprep.subr.mxu1 %v4392_v56  ;;  %3086 = vmatprep.subr.mxu0 %v4392_v56 }
 0x34f   :  { %3052 = vmatpush3.msra.mxu1 %v1975_v14  ;;  %3087 = vmatpush3.msra.mxu0 %v2064_v42 }
 0x350   :  { %3053 = vmatprep.subr.mxu1 %v4392_v56  ;;  %3088 = vmatprep.subr.mxu0 %v4392_v56 }
 0x351   :  { %3054 = vmatpush3.msra.mxu1 %v1974_v2  ;;  %3089 = vmatpush3.msra.mxu0 %v2063_v6 }
 0x352   :  { %3055 = vmatprep.subr.mxu1 %v4392_v56  ;;  %3090 = vmatprep.subr.mxu0 %v4392_v56 }
 0x353   :  { %3056 = vmatpush3.msra.mxu1 %v1973_v27  ;;  %3091 = vmatpush3.msra.mxu0 %v2062_v8 }
 0x354   :  { %3057 = vmatprep.subr.mxu1 %v4392_v56  ;;  %3092 = vmatprep.subr.mxu0 %v4392_v56 }
 0x355   :  { %3058 = vmatpush3.msra.mxu1 %v1972_v49  ;;  %3093 = vmatpush3.msra.mxu0 %v2061_v44 }
 0x356   :  { %3059 = vmatprep.subr.mxu1 %v4392_v56  ;;  %3094 = vmatprep.subr.mxu0 %v4392_v56 }
 0x357   :  { %3060 = vmatpush3.msra.mxu1 %v1971_v31  ;;  %3095 = vmatpush3.msra.mxu0 %v2060_v57 }
 0x358   :  { %3061 = vmatprep.subr.mxu1 %v4392_v56  ;;  %3096 = vmatprep.subr.mxu0 %v4392_v56 }
 0x359   :  { %3062 = vmatpush3.msra.mxu1 %v1970_v1  ;;  %3097 = vmatpush3.msra.mxu0 %v2059_v23 }
 0x35a   :  { %3063 = vmatprep.subr.mxu1 %v4392_v56  ;;  %3098 = vmatprep.subr.mxu0 %v4392_v56 }
 0x35b   :  { %3064 = vmatpush3.msra.mxu1 %v1969_v43  ;;  %3065 = vmatprep.mubr.msk.f32.mxu1 %vm3175_vm10, %v4392_v56 }
 0x35c   :  { %3099 = vmatpush3.msra.mxu0 %v2058_v26  ;;  %3100 = vmatprep.mubr.msk.f32.mxu0 %vm3175_vm10, %v4392_v56 }
 0x35d   :  { %3066 = vmatmul.mubr.f32.vlgmr.msra.gmra.mxu1 %v1968_v28  ;;  %3101 = vmatmul.mubr.f32.vlgmr.msra.gmra.mxu0 %v2057_v36 }
 0x35e   :  { %3103 = vmatprep.subr.mxu1 %v4392_v56  ;;  %3119 = vmatprep.mubr.msk.f32.mxu1 %vm3175_vm10, %v4392_v56 }
 0x35f   :  { %3104 = vmatpush3.msra.mxu1 %v2161_v50 }
 0x360   :  { %3105 = vmatprep.subr.mxu1 %v4392_v56 }
 0x361   :  { %3106 = vmatpush3.msra.mxu1 %v2160_v47 }
 0x362   :  { %3107 = vmatprep.subr.mxu1 %v4392_v56 }
 0x363   :  { %3108 = vmatpush3.msra.mxu1 %v2159_v12 }
 0x364   :  { %3109 = vmatprep.subr.mxu1 %v4392_v56 }
 0x365   :  { %3110 = vmatpush3.msra.mxu1 %v2158_v29 }
 0x366   :  { %3111 = vmatprep.subr.mxu1 %v4392_v56 }
 0x367   :  { %3112 = vmatpush3.msra.mxu1 %v2157_v55 }
 0x368   :  { %3113 = vmatprep.subr.mxu1 %v4392_v56 }
 0x369   :  { %3114 = vmatpush3.msra.mxu1 %v2156_v52 }
 0x36a   :  { %3115 = vmatprep.subr.mxu1 %v4392_v56 }
 0x36b   :  { %3116 = vmatpush3.msra.mxu1 %v2155_v18 }
 0x36c   :  { %3117 = vmatprep.subr.mxu1 %v4392_v56 }
 0x36d   :  { %3118 = vmatpush3.msra.mxu1 %v2154_v5 }
 0x3b8   :  { %v1537_v33 = vpop.f32.mrf.mxu1  ;;  %v1607_v24 = vpop.f32.mrf.mxu0 }
 0x3b9   :  { %v1608_v35 = vadd.f32 %v1607_v24, %v1537_v33 }
 0x3ba   :  { %v2857_v30 = vpop.f32.mrf.mxu1  ;;  %v2892_v63 = vpop.f32.mrf.mxu0 }
 0x3d9   :  { %v1695_v54 = vpop.f32.mrf.mxu1  ;;  %v1784_v34 = vpop.f32.mrf.mxu0 }
 0x3da   :  { %v1699_v9 = vadd.f32 %v1695_v54, %v1608_v35 }
 0x3db   :  { %v2927_v38 = vpop.f32.mrf.mxu1  ;;  %v2962_v46 = vpop.f32.mrf.mxu0 }
 0x3dc   :  { %v1788_v53 = vadd.f32 %v1784_v34, %v1699_v9 }
 0x3fb   :  { %v1873_v48 = vpop.f32.mrf.mxu1  ;;  %v1962_v37 = vpop.f32.mrf.mxu0 }
 0x3fc   :  { %v1877_v58 = vadd.f32 %v1873_v48, %v1788_v53 }
 0x3fd   :  { %v2997_v0 = vpop.f32.mrf.mxu1  ;;  %v3032_v3 = vpop.f32.mrf.mxu0 }
 0x3fe   :  { %v1966_v45 = vadd.f32 %v1962_v37, %v1877_v58 }
 0x41d   :  { %v2051_v7 = vpop.f32.mrf.mxu1  ;;  %v2140_v56 = vpop.f32.mrf.mxu0 }
 0x41e   :  { %v2055_v21 = vadd.f32 %v2051_v7, %v1966_v45 }
 0x41f   :  { %v3067_v17 = vpop.f32.mrf.mxu1  ;;  %v3102_v51 = vpop.f32.mrf.mxu0 }
 0x420   :  { %v2144_v62 = vadd.f32 %v2140_v56, %v2055_v21 }
 0x422   :  { %v2152_v39 = vadd.f32 %v2360_v4, %v2144_v62 }
 0x424   :  { %v2153_v11 = vmax.f32 %v2152_v39, 0.0 }
 0x426   :  { %2272 = vrot.lane.b32.xlu1 %v2153_v11, %s3176_s19  ;;  %2263 = vrot.lane.b32.xlu0 %v2153_v11, %s3177_s20 }
 0x427   :  { %3120 = vmatmul.mubr.msk.f32.vlgmr.msra.gmra.mxu1 %vm250_vm5, %v2153_v11 }
 0x498   :  { %v2264_v19 = vpop.permute.xlu0 %2263  ;;  %v2273_v32 = vpop.permute.xlu1 %2272 }
 0x499   :  { %v2267_v59 = vsel %vm2266_vm11, %v2264_v19, 0.0  ;;  %v2275_v25 = vsel %vm2266_vm11, %v2273_v32, 0.0 }
 0x49a   :  { %2268 = vadd.xlane.f32.xlu1 %v2267_v59 }
 0x4e7   :  { %v2238_v40 = vpop.f32.mrf.mxu1 }
 0x4e8   :  { %v2239_v10 = vadd.f32 %v2361_v61, %v2238_v40 }
 0x4e9   :  { %v3121_v22 = vpop.f32.mrf.mxu1 }
 0x4ea   :  { %v2242_v20 = vmax.f32 %v2239_v10, 0.0 }
 0x4ec   :  { %v2250_v41 = vmul.f32 %v2363_v13, %v2242_v20 }
 0x4ee   :  { %v2252_v16 = vsel %vm2251_vm12, %v2250_v41, 0.0 }
 0x4ef   :  { %2253 = vadd.xlane.f32.xlu0 %v2252_v16 }
 0x4f3   :  { %2276 = vadd.xlane.f32.xlu0 %v2275_v25 }
 0x523   :  { %v2269_v2 = vpop.xlane.xlu1 %2268 }
 0x524   :  { %v2271_v27 = vmul.f32 0.16666667, %v2269_v2 }
 0x578   :  { %v2254_v14 = vpop.xlane.xlu0 %2253 }
 0x579   :  { %v2262_v42 = vadd.f32 %v2364_v60, %v2254_v14 }
 0x57b   :  { %2283 = vperm.xlu0 %3165, %v2262_v42  }
 0x57c   :  { %v2277_v6 = vpop.xlane.xlu0 %2276 }
 0x57d   :  { %v2278_v8 = vmul.f32 0.16666667, %v2277_v6 }
 0x57f   :  { %v2280_v49 = vsel %vm2279_vm13, %v2271_v27, %v2278_v8 }
 0x580   :  { %2288 = vrot.lane.b32.xlu1 %v2280_v49, %s3177_s20 }
 0x5f2   :  { %v2289_v57 = vpop.permute.xlu1 %2288 }
 0x5f6   :  { %v2284_v44 = vpop.permute.xlu0 %2283 }
 0x5f7   :  { %v2286_v31 = vadd.f32 %v2284_v44, %v2153_v11 }
 0x5f9   :  { %v2291_v1 = vsub.f32 %v2286_v31, %v2289_v57 }
 0x5fb   :  { %2293 = vrot.lane.b32.xlu1 %v2291_v1, %s3177_s20 }
 0x66d   :  { %v2294_v23 = vpop.permute.xlu1 %2293 }
 0x66e   :  { %2297 = vst.msk [vmem:[%s4384_s16] sm:$0x3] %vm2296_vm14, %v2294_v23 }

</bundles_post_ra>
